<compile_context>
chip_gen: v6e
topology: v6e:2x2x1
jax: 0.10.0
libtpu: 0.0.40
codegen_flags: <defaults>
</compile_context>

<pallas_src>
import functools

import jax
import jax.numpy as jnp
from jax.experimental import pallas as pl
from jax.experimental.pallas import tpu as pltpu

LANE = 128  # all feature dims in this config are <= 128


# ----------------------------------------------------------------------------
# Parameter slab packing (one DMA for all weights/biases)
# ----------------------------------------------------------------------------
def _pad_rows(a, rows):
    """Zero-pad a 2D f32 array to (rows, LANE)."""
    r, c = a.shape
    assert r <= rows and c <= LANE, (a.shape, rows, LANE)
    return jnp.pad(a.astype(jnp.float32), ((0, rows - r), (0, LANE - c)))


def pack_params(params, dim_raw_pad):
    """Packs all params into one (total_rows, 128) slab.

    Weights are zero-padded to (128, 128) tiles (K padded with zero rows, out
    features padded with zero lanes) so the kernel's activations can stay
    lane-padded at 128 throughout; biases occupy row 0 of an 8-row region.
    Returns (slab, static_row_offsets) in kernel consumption order.
    """
    pieces, offsets = [], []

    def _add(arr, rows):
        offsets.append(sum(p.shape[0] for p in pieces))
        pieces.append(_pad_rows(arr, rows))

    _add(params["enc_w"], dim_raw_pad)              # encoder weight (K = dim_raw)
    _add(params["enc_b"].reshape(1, -1), 8)
    _add(params["pre_w"], LANE)                     # pre-MP
    _add(params["pre_b"].reshape(1, -1), 8)
    for ws, wn, b in params["sage"]:                # SAGE: self / neighbor / bias
        _add(ws, LANE)
        _add(wn, LANE)
        _add(b.reshape(1, -1), 8)
    for w, b in params["post"]:                     # post-MP MLP
        _add(w, LANE)
        _add(b.reshape(1, -1), 8)
    return jnp.concatenate(pieces, axis=0), offsets


# ----------------------------------------------------------------------------
# Fused forward kernel
# ----------------------------------------------------------------------------
def _make_fused_kernel(offsets, dim_raw_pad, n_pad, graphs_per_block,
                       layers_mp, layers_post_mp):
    """kernel(x_ref (B*N, Draw), a_ref (B, N, N) bf16, p_ref slab, o_ref (B*N, 128))."""

    def kernel(x_ref, a_ref, p_ref, o_ref):
        f32 = jnp.float32
        it = iter(offsets)

        def wmat(rows=LANE):                  # static slab slice: weight tile
            off = next(it)
            return p_ref[off:off + rows, :]

        def brow():                           # static slab slice: (1, 128) bias
            off = next(it)
            return p_ref[off:off + 1, :]

        # FeatureEncoder: Linear node encoder, no activation.
        h = jnp.dot(x_ref[...], wmat(dim_raw_pad),
                    preferred_element_type=f32) + brow()

        # GNNPreMP (1 layer): Linear + ReLU.
        h = jnp.maximum(
            jnp.dot(h, wmat(), preferred_element_type=f32) + brow(), 0.0)

        # Message passing: SAGEConv (mean aggregation) + ReLU.
        #   h <- ReLU(h @ W_self + (A @ h) @ W_neigh + b)
        # Two dots on separate slab slices (no lane-axis concat); aggregation
        # runs as bf16 x bf16 on the MXU with f32 accumulation; the per-graph
        # aggregations are stitched back along sublanes (cheap).
        for _ in range(layers_mp):
            w_self, w_neigh, b = wmat(), wmat(), brow()
            h_bf = h.astype(jnp.bfloat16)
            aggs = []
            for s in range(graphs_per_block):
                h_s = h_bf[s * n_pad:(s + 1) * n_pad, :]
                aggs.append(jnp.dot(a_ref[s], h_s, preferred_element_type=f32))
            agg = aggs[0] if graphs_per_block == 1 else jnp.concatenate(aggs, 0)
            h = (jnp.dot(h, w_self, preferred_element_type=f32)
                 + jnp.dot(agg, w_neigh, preferred_element_type=f32) + b)
            h = jnp.maximum(h, 0.0)

        # Post-MP MLP: ReLU on hidden layers, none on the last.
        for li in range(layers_post_mp):
            h = jnp.dot(h, wmat(), preferred_element_type=f32) + brow()
            if li != layers_post_mp - 1:
                h = jnp.maximum(h, 0.0)

        o_ref[...] = h                        # lane-dense (…, 128) store

    return kernel


def custom_gnn_forward(params, x_raw, a_norm):
    """Fused CustomGNN forward for a batch of graphs.

    x_raw:  (G, N, dim_raw) f32 node features
    a_norm: (G, N, N) f32 row-normalized (mean) adjacency
    returns (G, N, dim_out) f32
    """
    g, n, dim_raw = x_raw.shape
    dim_out = params["post"][-1][0].shape[1]

    # Pad node rows to a sublane multiple and raw features to an 8-multiple.
    n_pad = -(-n // 8) * 8
    dim_raw_pad = -(-dim_raw // 8) * 8
    if (n_pad, dim_raw_pad) != (n, dim_raw):
        x_raw = jnp.pad(x_raw, ((0, 0), (0, n_pad - n), (0, dim_raw_pad - dim_raw)))
        a_norm = jnp.pad(a_norm, ((0, 0), (0, n_pad - n), (0, n_pad - n)))

    # bf16 adjacency: halves the dominant O(N^2) DMA / VMEM footprint.
    a_bf16 = a_norm.astype(jnp.bfloat16)

    # Fold 2 graphs per grid block so dense-layer dots run at M=256
    # (fills the 256-wide MXU on v6e/v7x); fall back to 1 if G is odd.
    graphs_per_block = 2 if g % 2 == 0 else 1
    m_blk = graphs_per_block * n_pad
    x_flat = x_raw.reshape(g * n_pad, dim_raw_pad)

    slab, offsets = pack_params(params, dim_raw_pad)
    kernel = _make_fused_kernel(offsets, dim_raw_pad, n_pad, graphs_per_block,
                                len(params["sage"]), len(params["post"]))

    out = pl.pallas_call(
        kernel,
        out_shape=jax.ShapeDtypeStruct((g * n_pad, LANE), jnp.float32),
        grid=(g // graphs_per_block,),
        in_specs=[
            pl.BlockSpec((m_blk, dim_raw_pad), lambda i: (i, 0)),
            pl.BlockSpec((graphs_per_block, n_pad, n_pad), lambda i: (i, 0, 0)),
            pl.BlockSpec(slab.shape, lambda i: (0, 0)),   # resident param slab
        ],
        out_specs=pl.BlockSpec((m_blk, LANE), lambda i: (i, 0)),
        compiler_params=pltpu.CompilerParams(
            dimension_semantics=("parallel",),            # shard graphs over TCs
            vmem_limit_bytes=32 * 1024 * 1024),
    )(x_flat, a_bf16, slab)

    return out.reshape(g, n_pad, LANE)[:, :n, :dim_out]
    # TODO(synk): for large graphs, replace the dense A@X aggregation with a
    # scalar-prefetch CSR gather (O(E*F) instead of O(N^2*F)) and row-tile A.


# ----------------------------------------------------------------------------
# Parameter init (deterministic, Glorot-uniform style) + graph helper
# ----------------------------------------------------------------------------
def _glorot(key, f_in, f_out):
    lim = (6.0 / (f_in + f_out)) ** 0.5
    return jax.random.uniform(key, (f_in, f_out), jnp.float32, -lim, lim)


def _bias(key, f_out):
    return jax.random.uniform(key, (f_out,), jnp.float32, -0.1, 0.1)


def init_params(key, dim_raw, dim_in, dim_inner, dim_out, layers_mp,
                layers_post_mp):
    keys = iter(jax.random.split(key, 16 + 4 * layers_mp + 2 * layers_post_mp))
    params = {
        "enc_w": _glorot(next(keys), dim_raw, dim_in),
        "enc_b": _bias(next(keys), dim_in),
        "pre_w": _glorot(next(keys), dim_in, dim_inner),
        "pre_b": _bias(next(keys), dim_inner),
        "sage": [],
        "post": [],
    }
    for _ in range(layers_mp):
        params["sage"].append((_glorot(next(keys), dim_inner, dim_inner),   # W_self
                               _glorot(next(keys), dim_inner, dim_inner),   # W_neigh
                               _bias(next(keys), dim_inner)))
    for li in range(layers_post_mp):
        f_out = dim_out if li == layers_post_mp - 1 else dim_inner
        params["post"].append((_glorot(next(keys), dim_inner, f_out),
                               _bias(next(keys), f_out)))
    return params


def build_mean_adjacency(edge_index, num_nodes):
    """Dense row-normalized adjacency: A[i, j] = 1/deg(i) for edge j->i.
    (Repeated random edges are deduplicated, matching a simple-graph mean.)"""
    src, dst = edge_index
    a = jnp.zeros((num_nodes, num_nodes), jnp.float32)
    a = a.at[dst, src].set(1.0)  # messages flow src -> dst
    deg = jnp.maximum(a.sum(axis=1, keepdims=True), 1.0)
    return a / deg


def reference_forward(params, x_raw, a_norm, bf16_agg=False):
    """Pure-JAX reference.  bf16_agg=True mirrors the kernel's bf16 aggregation."""
    dot = functools.partial(jnp.dot, precision=jax.lax.Precision.HIGHEST)
    if bf16_agg:
        a = a_norm.astype(jnp.bfloat16)
        agg_fn = lambda h: jnp.matmul(a, h.astype(jnp.bfloat16),
                                      preferred_element_type=jnp.float32)
    else:
        agg_fn = lambda h: jnp.matmul(a_norm, h,
                                      precision=jax.lax.Precision.HIGHEST)
    h = dot(x_raw, params["enc_w"]) + params["enc_b"]
    h = jnp.maximum(dot(h, params["pre_w"]) + params["pre_b"], 0.0)
    for ws, wn, b in params["sage"]:
        h = jnp.maximum(dot(h, ws) + dot(agg_fn(h), wn) + b, 0.0)
    n_post = len(params["post"])
    for i, (w, b) in enumerate(params["post"]):
        h = dot(h, w) + b
        if i != n_post - 1:
            h = jnp.maximum(h, 0.0)
    return h


# ----------------------------------------------------------------------------
if __name__ == "__main__":
    G = 4            # graphs per batch (grid axis; 2 graphs folded per block)
    N = 128          # nodes per graph
    E = 512          # edges per graph
    DIM_RAW = 16     # raw node feature dim
    DIM_IN = 16      # encoder output dim
    DIM_INNER = 32
    DIM_OUT = 8
    LAYERS_MP = 2
    LAYERS_POST_MP = 2

    key = jax.random.PRNGKey(0)
    k_x, k_e, k_p = jax.random.split(key, 3)

    x_raw = jax.random.normal(k_x, (G, N, DIM_RAW), jnp.float32)
    edge_index = jax.random.randint(k_e, (G, 2, E), 0, N)
    a_norm = jax.vmap(lambda ei: build_mean_adjacency(ei, N))(edge_index)

    params = init_params(k_p, DIM_RAW, DIM_IN, DIM_INNER, DIM_OUT,
                         LAYERS_MP, LAYERS_POST_MP)

    out = custom_gnn_forward(params, x_raw, a_norm)
    out = jax.block_until_ready(out)
    assert out.shape == (G, N, DIM_OUT), out.shape
    assert bool(jnp.all(jnp.isfinite(out)))

    # Tight check vs. a reference using the same (deliberate) bf16 aggregation,
    # and a looser check vs. the full-f32 reference (bounds the bf16-A error).
    ref_matched = reference_forward(params, x_raw, a_norm, bf16_agg=True)
    ref_exact = reference_forward(params, x_raw, a_norm, bf16_agg=False)
    assert jnp.allclose(out, ref_matched, rtol=1e-2, atol=1e-2), (
        float(jnp.max(jnp.abs(out - ref_matched))))
    assert jnp.allclose(out, ref_exact, rtol=5e-2, atol=5e-2), (
        float(jnp.max(jnp.abs(out - ref_exact))))

    print("KERNEL_OK")
</pallas_src>

<mosaic_0001>
module attributes {stable_mosaic.version = 11 : i64} {
  func.func @kernel(%arg0: i32, %arg1: memref<256x16xf32, #tpu.memory_space<vmem>>, %arg2: memref<2x128x128xbf16, #tpu.memory_space<vmem>>, %arg3: memref<960x128xf32, #tpu.memory_space<vmem>>, %arg4: memref<256x128xf32, #tpu.memory_space<vmem>>) attributes {dimension_semantics = [#tpu.dimension_semantics<parallel>], iteration_bounds = array<i64: 2>, scalar_prefetch = 0 : i64, scratch_operands = 0 : i64, tpu.core_type = #tpu.core_type<tc>, window_params = [{transform_indices = @transform_0, window_bounds = array<i64: 256, 16>}, {transform_indices = @transform_1, window_bounds = array<i64: 2, 128, 128>}, {pipeline_mode = #tpu.pipeline_mode<synchronous>, transform_indices = @transform_2, window_bounds = array<i64: 960, 128>}, {transform_indices = @transform_3, window_bounds = array<i64: 256, 128>}]} {
    %c0 = arith.constant 0 : index
    %c0_0 = arith.constant 0 : index
    %0 = vector.load %arg1[%c0, %c0_0] : memref<256x16xf32, #tpu.memory_space<vmem>>, vector<256x16xf32>
    %c0_1 = arith.constant 0 : index
    %c0_2 = arith.constant 0 : index
    %1 = vector.load %arg3[%c0_1, %c0_2] : memref<960x128xf32, #tpu.memory_space<vmem>>, vector<16x128xf32>
    %cst = arith.constant dense<0.000000e+00> : vector<256x128xf32>
    %2 = tpu.matmul %0, %1, %cst {dimension_numbers = #tpu.dot_dimension_numbers<[1], [0], [0], [1], [0, 0, 1, 1], [], []>} : vector<256x16xf32>, vector<16x128xf32>, vector<256x128xf32> -> vector<256x128xf32>
    %c16 = arith.constant 16 : index
    %c0_3 = arith.constant 0 : index
    %3 = vector.load %arg3[%c16, %c0_3] : memref<960x128xf32, #tpu.memory_space<vmem>>, vector<1x128xf32>
    %4 = vector.broadcast %3 : vector<1x128xf32> to vector<256x128xf32>
    %5 = arith.addf %2, %4 : vector<256x128xf32>
    %c24 = arith.constant 24 : index
    %c0_4 = arith.constant 0 : index
    %6 = vector.load %arg3[%c24, %c0_4] : memref<960x128xf32, #tpu.memory_space<vmem>>, vector<128x128xf32>
    %cst_5 = arith.constant dense<0.000000e+00> : vector<256x128xf32>
    %7 = tpu.matmul %5, %6, %cst_5 {dimension_numbers = #tpu.dot_dimension_numbers<[1], [0], [0], [1], [0, 0, 1, 1], [], []>} : vector<256x128xf32>, vector<128x128xf32>, vector<256x128xf32> -> vector<256x128xf32>
    %c152 = arith.constant 152 : index
    %c0_6 = arith.constant 0 : index
    %8 = vector.load %arg3[%c152, %c0_6] : memref<960x128xf32, #tpu.memory_space<vmem>>, vector<1x128xf32>
    %9 = vector.broadcast %8 : vector<1x128xf32> to vector<256x128xf32>
    %10 = arith.addf %7, %9 : vector<256x128xf32>
    %cst_7 = arith.constant 0.000000e+00 : f32
    %11 = vector.broadcast %cst_7 : f32 to vector<256x128xf32>
    %12 = arith.maximumf %10, %11 : vector<256x128xf32>
    %c160 = arith.constant 160 : index
    %c0_8 = arith.constant 0 : index
    %13 = vector.load %arg3[%c160, %c0_8] : memref<960x128xf32, #tpu.memory_space<vmem>>, vector<128x128xf32>
    %c288 = arith.constant 288 : index
    %c0_9 = arith.constant 0 : index
    %14 = vector.load %arg3[%c288, %c0_9] : memref<960x128xf32, #tpu.memory_space<vmem>>, vector<128x128xf32>
    %c416 = arith.constant 416 : index
    %c0_10 = arith.constant 0 : index
    %15 = vector.load %arg3[%c416, %c0_10] : memref<960x128xf32, #tpu.memory_space<vmem>>, vector<1x128xf32>
    %16 = arith.truncf %12 : vector<256x128xf32> to vector<256x128xbf16>
    %17 = vector.extract_strided_slice %16 {offsets = [0, 0], sizes = [128, 128], strides = [1, 1]} : vector<256x128xbf16> to vector<128x128xbf16>
    %c0_11 = arith.constant 0 : index
    %c0_12 = arith.constant 0 : index
    %c0_13 = arith.constant 0 : index
    %18 = vector.load %arg2[%c0_11, %c0_12, %c0_13] : memref<2x128x128xbf16, #tpu.memory_space<vmem>>, vector<1x128x128xbf16>
    %19 = vector.shape_cast %18 : vector<1x128x128xbf16> to vector<128x128xbf16>
    %cst_14 = arith.constant dense<0.000000e+00> : vector<128x128xf32>
    %20 = tpu.matmul %19, %17, %cst_14 {dimension_numbers = #tpu.dot_dimension_numbers<[1], [0], [0], [1], [0, 0, 1, 1], [], []>} : vector<128x128xbf16>, vector<128x128xbf16>, vector<128x128xf32> -> vector<128x128xf32>
    %21 = vector.extract_strided_slice %16 {offsets = [128, 0], sizes = [128, 128], strides = [1, 1]} : vector<256x128xbf16> to vector<128x128xbf16>
    %c1 = arith.constant 1 : index
    %c0_15 = arith.constant 0 : index
    %c0_16 = arith.constant 0 : index
    %22 = vector.load %arg2[%c1, %c0_15, %c0_16] : memref<2x128x128xbf16, #tpu.memory_space<vmem>>, vector<1x128x128xbf16>
    %23 = vector.shape_cast %22 : vector<1x128x128xbf16> to vector<128x128xbf16>
    %cst_17 = arith.constant dense<0.000000e+00> : vector<128x128xf32>
    %24 = tpu.matmul %23, %21, %cst_17 {dimension_numbers = #tpu.dot_dimension_numbers<[1], [0], [0], [1], [0, 0, 1, 1], [], []>} : vector<128x128xbf16>, vector<128x128xbf16>, vector<128x128xf32> -> vector<128x128xf32>
    %25 = tpu.concatenate %20, %24 in 0 : vector<128x128xf32>, vector<128x128xf32> -> vector<256x128xf32>
    %cst_18 = arith.constant dense<0.000000e+00> : vector<256x128xf32>
    %26 = tpu.matmul %12, %13, %cst_18 {dimension_numbers = #tpu.dot_dimension_numbers<[1], [0], [0], [1], [0, 0, 1, 1], [], []>} : vector<256x128xf32>, vector<128x128xf32>, vector<256x128xf32> -> vector<256x128xf32>
    %cst_19 = arith.constant dense<0.000000e+00> : vector<256x128xf32>
    %27 = tpu.matmul %25, %14, %cst_19 {dimension_numbers = #tpu.dot_dimension_numbers<[1], [0], [0], [1], [0, 0, 1, 1], [], []>} : vector<256x128xf32>, vector<128x128xf32>, vector<256x128xf32> -> vector<256x128xf32>
    %28 = arith.addf %26, %27 : vector<256x128xf32>
    %29 = vector.broadcast %15 : vector<1x128xf32> to vector<256x128xf32>
    %30 = arith.addf %28, %29 : vector<256x128xf32>
    %cst_20 = arith.constant 0.000000e+00 : f32
    %31 = vector.broadcast %cst_20 : f32 to vector<256x128xf32>
    %32 = arith.maximumf %30, %31 : vector<256x128xf32>
    %c424 = arith.constant 424 : index
    %c0_21 = arith.constant 0 : index
    %33 = vector.load %arg3[%c424, %c0_21] : memref<960x128xf32, #tpu.memory_space<vmem>>, vector<128x128xf32>
    %c552 = arith.constant 552 : index
    %c0_22 = arith.constant 0 : index
    %34 = vector.load %arg3[%c552, %c0_22] : memref<960x128xf32, #tpu.memory_space<vmem>>, vector<128x128xf32>
    %c680 = arith.constant 680 : index
    %c0_23 = arith.constant 0 : index
    %35 = vector.load %arg3[%c680, %c0_23] : memref<960x128xf32, #tpu.memory_space<vmem>>, vector<1x128xf32>
    %36 = arith.truncf %32 : vector<256x128xf32> to vector<256x128xbf16>
    %37 = vector.extract_strided_slice %36 {offsets = [0, 0], sizes = [128, 128], strides = [1, 1]} : vector<256x128xbf16> to vector<128x128xbf16>
    %c0_24 = arith.constant 0 : index
    %c0_25 = arith.constant 0 : index
    %c0_26 = arith.constant 0 : index
    %38 = vector.load %arg2[%c0_24, %c0_25, %c0_26] : memref<2x128x128xbf16, #tpu.memory_space<vmem>>, vector<1x128x128xbf16>
    %39 = vector.shape_cast %38 : vector<1x128x128xbf16> to vector<128x128xbf16>
    %cst_27 = arith.constant dense<0.000000e+00> : vector<128x128xf32>
    %40 = tpu.matmul %39, %37, %cst_27 {dimension_numbers = #tpu.dot_dimension_numbers<[1], [0], [0], [1], [0, 0, 1, 1], [], []>} : vector<128x128xbf16>, vector<128x128xbf16>, vector<128x128xf32> -> vector<128x128xf32>
    %41 = vector.extract_strided_slice %36 {offsets = [128, 0], sizes = [128, 128], strides = [1, 1]} : vector<256x128xbf16> to vector<128x128xbf16>
    %c1_28 = arith.constant 1 : index
    %c0_29 = arith.constant 0 : index
    %c0_30 = arith.constant 0 : index
    %42 = vector.load %arg2[%c1_28, %c0_29, %c0_30] : memref<2x128x128xbf16, #tpu.memory_space<vmem>>, vector<1x128x128xbf16>
    %43 = vector.shape_cast %42 : vector<1x128x128xbf16> to vector<128x128xbf16>
    %cst_31 = arith.constant dense<0.000000e+00> : vector<128x128xf32>
    %44 = tpu.matmul %43, %41, %cst_31 {dimension_numbers = #tpu.dot_dimension_numbers<[1], [0], [0], [1], [0, 0, 1, 1], [], []>} : vector<128x128xbf16>, vector<128x128xbf16>, vector<128x128xf32> -> vector<128x128xf32>
    %45 = tpu.concatenate %40, %44 in 0 : vector<128x128xf32>, vector<128x128xf32> -> vector<256x128xf32>
    %cst_32 = arith.constant dense<0.000000e+00> : vector<256x128xf32>
    %46 = tpu.matmul %32, %33, %cst_32 {dimension_numbers = #tpu.dot_dimension_numbers<[1], [0], [0], [1], [0, 0, 1, 1], [], []>} : vector<256x128xf32>, vector<128x128xf32>, vector<256x128xf32> -> vector<256x128xf32>
    %cst_33 = arith.constant dense<0.000000e+00> : vector<256x128xf32>
    %47 = tpu.matmul %45, %34, %cst_33 {dimension_numbers = #tpu.dot_dimension_numbers<[1], [0], [0], [1], [0, 0, 1, 1], [], []>} : vector<256x128xf32>, vector<128x128xf32>, vector<256x128xf32> -> vector<256x128xf32>
    %48 = arith.addf %46, %47 : vector<256x128xf32>
    %49 = vector.broadcast %35 : vector<1x128xf32> to vector<256x128xf32>
    %50 = arith.addf %48, %49 : vector<256x128xf32>
    %cst_34 = arith.constant 0.000000e+00 : f32
    %51 = vector.broadcast %cst_34 : f32 to vector<256x128xf32>
    %52 = arith.maximumf %50, %51 : vector<256x128xf32>
    %c688 = arith.constant 688 : index
    %c0_35 = arith.constant 0 : index
    %53 = vector.load %arg3[%c688, %c0_35] : memref<960x128xf32, #tpu.memory_space<vmem>>, vector<128x128xf32>
    %cst_36 = arith.constant dense<0.000000e+00> : vector<256x128xf32>
    %54 = tpu.matmul %52, %53, %cst_36 {dimension_numbers = #tpu.dot_dimension_numbers<[1], [0], [0], [1], [0, 0, 1, 1], [], []>} : vector<256x128xf32>, vector<128x128xf32>, vector<256x128xf32> -> vector<256x128xf32>
    %c816 = arith.constant 816 : index
    %c0_37 = arith.constant 0 : index
    %55 = vector.load %arg3[%c816, %c0_37] : memref<960x128xf32, #tpu.memory_space<vmem>>, vector<1x128xf32>
    %56 = vector.broadcast %55 : vector<1x128xf32> to vector<256x128xf32>
    %57 = arith.addf %54, %56 : vector<256x128xf32>
    %cst_38 = arith.constant 0.000000e+00 : f32
    %58 = vector.broadcast %cst_38 : f32 to vector<256x128xf32>
    %59 = arith.maximumf %57, %58 : vector<256x128xf32>
    %c824 = arith.constant 824 : index
    %c0_39 = arith.constant 0 : index
    %60 = vector.load %arg3[%c824, %c0_39] : memref<960x128xf32, #tpu.memory_space<vmem>>, vector<128x128xf32>
    %cst_40 = arith.constant dense<0.000000e+00> : vector<256x128xf32>
    %61 = tpu.matmul %59, %60, %cst_40 {dimension_numbers = #tpu.dot_dimension_numbers<[1], [0], [0], [1], [0, 0, 1, 1], [], []>} : vector<256x128xf32>, vector<128x128xf32>, vector<256x128xf32> -> vector<256x128xf32>
    %c952 = arith.constant 952 : index
    %c0_41 = arith.constant 0 : index
    %62 = vector.load %arg3[%c952, %c0_41] : memref<960x128xf32, #tpu.memory_space<vmem>>, vector<1x128xf32>
    %63 = vector.broadcast %62 : vector<1x128xf32> to vector<256x128xf32>
    %64 = arith.addf %61, %63 : vector<256x128xf32>
    %c0_42 = arith.constant 0 : index
    %c0_43 = arith.constant 0 : index
    %65 = vector.load %arg4[%c0_42, %c0_43] : memref<256x128xf32, #tpu.memory_space<vmem>>, vector<256x128xf32>
    tpu.vector_store %arg4[%c0_42, %c0_43], %64 {strides = array<i32>} : memref<256x128xf32, #tpu.memory_space<vmem>>, vector<256x128xf32>,
    return
  }
  func.func @transform_0(%arg0: i32) -> (i32, i32) {
    %c0_i32 = arith.constant 0 : i32
    %c0_i32_0 = arith.constant 0 : i32
    return %arg0, %c0_i32 : i32, i32
  }
  func.func @transform_1(%arg0: i32) -> (i32, i32, i32) {
    %c0_i32 = arith.constant 0 : i32
    %c0_i32_0 = arith.constant 0 : i32
    %c0_i32_1 = arith.constant 0 : i32
    return %arg0, %c0_i32, %c0_i32_0 : i32, i32, i32
  }
  func.func @transform_2(%arg0: i32) -> (i32, i32) {
    %c0_i32 = arith.constant 0 : i32
    %c0_i32_0 = arith.constant 0 : i32
    %c0_i32_1 = arith.constant 0 : i32
    return %c0_i32, %c0_i32_0 : i32, i32
  }
  func.func @transform_3(%arg0: i32) -> (i32, i32) {
    %c0_i32 = arith.constant 0 : i32
    %c0_i32_0 = arith.constant 0 : i32
    return %arg0, %c0_i32 : i32, i32
  }
}

</mosaic_0001>

<bundles_post_ra>
// kernel: tpu_custom_call.1
= control target key start
LH: loop header
LB: loop body
LE: loop exit
PB: predicated region body
PF: predicated region fallthrough
CT: control target
= control target key end

     0   :  { %8 = vsyncpa [#allocation3], 0  ;;  %s5835_s0 = inlined_call_operand.vmem [shape: f32[512,16], index: 0, kind: input, shape index: {}]   ;;  %s5836_s1 = inlined_call_operand.vmem [shape: bf16[4,128,128], index: 1, kind: input, shape index: {}]   ;;  %s5837_s2 = inlined_call_operand.hbm [shape: f32[960,128], index: 2, kind: input, shape index: {}]   ;;  %s5838_s3 = inlined_call_operand.hbm [shape: f32[512,128], index: 3, kind: output, shape index: {}]  }
   0x1   :  { %9 = vsyncpa [#allocation4], 0 }
   0x2   :  { %11 = vsyncpa [#allocation4 + $0x1], 0  ;;  %s4642_s12 = smov 0   ;;  %s4644_s13 = smov 0  }
   0x3   :  { %s4646_s14 = smov 0   ;;  %s4648_s15 = smov 0  }
   0x4 LB: > { %s4663_s16 = sadd.s32 4294967295, %s4614_s15   ;;  %s3159_s17 = sadd.s32 4294967294, %s4614_s15   ;;  %s4614_s15 = sphi %s4648_s15, %s5947_s15   ;;  %s4610_s14 = sphi %s4646_s14, %s5946_s14   ;;  %s4606_s13 = sphi %s4644_s13, %s5945_s13   ;;  %s4602_s12 = sphi %s4642_s12, %s5944_s12  }
   0x5   : > { %s4667_s18 = sadd.s32 1, %s4614_s15   ;;  %s97_s19 = sadd.s32 1, %s4610_s14 }
   0x6   : > { %s94_s20 = ssub.s32 %s4614_s15, %s4667_s18  ;;  %p107_p0 = scmp.ne.s32.totalorder %s4610_s14, %s4606_s13 }
   0x7   : > { %p95_p1 = scmp.eq.s32.totalorder %s94_s20, 0  ;;  %p108_p2 = scmp.eq.s32.totalorder %s4663_s16, 1 }
   0x8   : > { %p113_p3 = scmp.ne.s32.totalorder %s4606_s13, %s4602_s12  ;;  %p114_p4 = scmp.eq.s32.totalorder %s3159_s17, 1 }
   0x9   : > { %s4678_s21 = scalar_select %p95_p1, %s4610_s14, %s97_s19  }
   0xa   : > { %p4680_p5 = por %p108_p2, %p107_p0  ;;  %p4684_p6 = por %p114_p4, %p113_p3 }
   0xb   : > { %p3160_p7 = scmp.ge.s32.totalorder %s4614_s15, 1  ;;  %p121_p8 = scmp.lt.s32.totalorder %s4614_s15, 3 }
   0xc   : > { %s5882_s23 = scalar_select %p4684_p6, 1, 0 }
   0xd   : > { %p4468_p9 = scmp.eq.s32.totalorder %s4663_s16, 0  ;;  %p4691_p10 = pnand %p3160_p7, %p121_p8 }
   0xe   : > { %s4616_s25 = smov [#allocation2]  }
   0xf   : > { %s133_s26 = sshll.u32 %s4616_s25, 4  ;;  %p4460_p11 = pneg %p4691_p10  ;;  %s134_s26 = int_to_ptr.vmem [resolvable:$true] %s133_s26 }
  0x10   : > { %s4535_s27 = scalar_lea.vmem %s134_s26, 15360  ;;  %p4543_p3 = scmp.lt.s32.totalorder %s134_s26, %s134_s26 }
  0x11   : > { %p4461_p12 = pnand %p4468_p9, %p4460_p11  ;;  %p4536_p0 = scmp.ne.s32.totalorder %s134_s26, %s4535_s27 }
  0x12   : > { %p4544_p4 = scmp.lt.s32.totalorder %s4535_s27, %s4535_s27 }
  0x13   : > { %p4526_p13 = pneg %p4461_p12 }
  0x14   : > { %p4545_p6 = por %p4544_p4, %p4543_p3 }
  0x15   : > { %p4538_p1 = pnand %p4536_p0, %p4526_p13 }
  0x17   : > { %p4539_p2 = pneg %p4538_p1 }
  0x19   : > { %p4546_p7 = pnand %p4545_p6, %p4539_p2 }
  0x1b   : > { %4549 = shalt.err (!%p4546_p7)
}
  0x1c   : > { %s4617_s28 = smov 128   ;;  %s4618_s29 = smov 8  }
  0x1d   : > { %4463 = dma.hbm_to_vmem [thread:$0]  (!%p4461_p12), %s5837_s2, 15360, %s134_s26, [#allocation3], %s4617_s28, %s4617_s28, %s4618_s29  }
  0x1e   : > { %168 = sbr.rel (%p4691_p10) target bundleno = 1837 (0x72d), region = 32 }
  0x23   : > { %4593 = dma.done.wait (%p4468_p9), [#allocation3], 15360  }
  0x24   : > { %4595 = vsyncadd (%p4468_p9), [#allocation3], 4294951936  ;;  %s3166_s5 = sshll.u32 %s4663_s16, 5  ;;  %vm252_vm0 = vcmask 130048   ;;  %v246_v0 = vld [vmem:[#allocation2 + $0x8] sm:$0xff]  ;;  %v245_v1 = vld [vmem:[#allocation2] sm:$0xff] }
  0x25   : > { %p199_p8 = scmp.lt.s32.totalorder %s3166_s5, 63  ;;  %3682 = vmatprep.subr.mxu0 %v246_v0  ;;  %v589_v9 = vld [vmem:[#allocation2 + $0x90] sm:$0xff]  ;;  %v588_v10 = vld [vmem:[#allocation2 + $0x88] sm:$0xff]  ;;  %v587_v11 = vld [vmem:[#allocation2 + $0x80] sm:$0xff]  ;;  %s3168_s10 = sshll.u32 %s4663_s16, 1 }
  0x26   : > { %3683 = vmatpush3.msra.mxu0 %v246_v0  ;;  %3734 = vmatprep.subr.mxu1 %v589_v9  ;;  %v586_v14 = vld [vmem:[#allocation2 + $0x78] sm:$0xff]  ;;  %v585_v15 = vld [vmem:[#allocation2 + $0x70] sm:$0xff]  ;;  %v584_v18 = vld [vmem:[#allocation2 + $0x68] sm:$0xff]  ;;  %p205_p6 = scmp.lt.s32.totalorder %s3168_s10, 3  ;;  %s195_s24 = sand.u32 1, %s4606_s13  }
  0x27   : > { %s5949_s5 = smov (!%p199_p8, %s3166_s5), 63  ;;  %3684 = vmatprep.subr.mxu0 %v245_v1  ;;  %3735 = vmatpush3.msra.mxu1 %v589_v9  ;;  %v583_v19 = vld [vmem:[#allocation2 + $0x60] sm:$0xff]  ;;  %v582_v22 = vld [vmem:[#allocation2 + $0x58] sm:$0xff]  ;;  %v581_v23 = vld [vmem:[#allocation2 + $0x50] sm:$0xff]  ;;  %s3165_s25 = sshll.u32 %s195_s24, 8 }
  0x28   : > { %s3167_s6 = sshll.u32 %s5949_s5, 3  ;;  %3685 = vmatpush3.msra.mxu0 %v245_v1  ;;  %3736 = vmatprep.subr.mxu1 %v588_v10  ;;  %v580_v26 = vld [vmem:[#allocation2 + $0x48] sm:$0xff]  ;;  %v579_v27 = vld [vmem:[#allocation2 + $0x40] sm:$0xff]  ;;  %v578_v30 = vld [vmem:[#allocation2 + $0x38] sm:$0xff]  ;;  %s5951_s10 = smov (!%p205_p6, %s3168_s10), 3 }
  0x29   : > { %s4712_s9 = scalar_lea.vmem %s5835_s0, %s3167_s6  ;;  %3737 = vmatpush3.msra.mxu1 %v588_v10  ;;  %v577_v31 = vld [vmem:[#allocation2 + $0x30] sm:$0xff]  ;;  %v576_v47 = vld [vmem:[#allocation2 + $0x28] sm:$0xff]  ;;  %v575_v48 = vld [vmem:[#allocation2 + $0x20] sm:$0xff]  ;;  %s3246_s11 = sshll.u32 %s5951_s10, 6 }
  0x2a   : > { %v213_v2 = vld [vmem:[%s4712_s9] sm:$0xff]  ;;  %v214_v3 = vld [vmem:[%s4712_s9 + $0x8] sm:$0xff]  ;;  %v215_v4 = vld [vmem:[%s4712_s9 + $0x10] sm:$0xff]  ;;  %3738 = vmatprep.subr.mxu1 %v587_v11  ;;  %s4816_s20 = scalar_lea.vmem %s5836_s1, %s3246_s11  ;;  %s5719_s26 = scalar_lea.vmem [#allocation5], %s3165_s25 }
  0x2b   : > { %3686 = vmatprep.mubr.msk.f32.mxu0 %vm252_vm0, %v213_v2  ;;  %v216_v5 = vld [vmem:[%s4712_s9 + $0x18] sm:$0xff]  ;;  %v217_v6 = vld [vmem:[%s4712_s9 + $0x20] sm:$0xff]  ;;  %v218_v7 = vld [vmem:[%s4712_s9 + $0x28] sm:$0xff]  ;;  %3739 = vmatpush3.msra.mxu1 %v587_v11  ;;  %s3247_s27 = sshll.u32 %s4663_s16, 12  ;;  %s3073_s28 = sshll.u32 %s5719_s26, 4  ;;  %s5788_s28 = int_to_ptr.vmem [resolvable:$true] %s3073_s28 }
  0x2c   : > { %3687 = vmatmul.mubr.msk.f32.vlgmr.msra.gmra.mxu0 %vm252_vm0, %v214_v3  ;;  %v219_v8 = vld [vmem:[%s4712_s9 + $0x30] sm:$0xff]  ;;  %v220_v12 = vld [vmem:[%s4712_s9 + $0x38] sm:$0xff]  ;;  %v221_v13 = vld [vmem:[%s4712_s9 + $0x40] sm:$0xff]  ;;  %3740 = vmatprep.subr.mxu1 %v586_v14  ;;  %s5786_s4 = scalar_lea.hbm %s5838_s3, %s3247_s27  ;;  %s5795_s16 = scalar_lea.sflag [#allocation4], %s195_s24 }
  0x2d   : > { %3689 = vmatprep.mubr.msk.f32.mxu0 %vm252_vm0, %v215_v4  ;;  %v222_v16 = vld [vmem:[%s4712_s9 + $0x48] sm:$0xff]  ;;  %v223_v17 = vld [vmem:[%s4712_s9 + $0x50] sm:$0xff]  ;;  %3741 = vmatpush3.msra.mxu1 %v586_v14  ;;  %v224_v20 = vld [vmem:[%s4712_s9 + $0x58] sm:$0xff]  ;;  %s4550_s5 = scalar_lea.vmem %s5788_s28, 4096  ;;  %s4619_s6 = smov [#allocation5]  }
  0x2e   : > { %3742 = vmatprep.subr.mxu1 %v585_v15  ;;  %v225_v21 = vld [vmem:[%s4712_s9 + $0x60] sm:$0xff]  ;;  %v226_v24 = vld [vmem:[%s4712_s9 + $0x68] sm:$0xff]  ;;  %v227_v25 = vld [vmem:[%s4712_s9 + $0x70] sm:$0xff]  ;;  %p4551_p9 = scmp.ne.s32.totalorder %s5788_s28, %s4550_s5  ;;  %s4554_s7 = sshll.u32 %s4619_s6, 4  ;;  %s4555_s7 = int_to_ptr.vmem [resolvable:$false] %s4554_s7 }
  0x2f   : > { %3743 = vmatpush3.msra.mxu1 %v585_v15  ;;  %v228_v28 = vld [vmem:[%s4712_s9 + $0x78] sm:$0xff]  ;;  %v229_v29 = vld [vmem:[%s4712_s9 + $0x80] sm:$0xff]  ;;  %v230_v32 = vld [vmem:[%s4712_s9 + $0x88] sm:$0xff]  ;;  %s4556_s8 = scalar_lea.vmem %s4555_s7, 8192  ;;  %p4557_p12 = scmp.lt.s32.totalorder %s5788_s28, %s4555_s7 }
  0x30   : > { %3690 = vmatmul.mubr.msk.f32.gmra.mxu0 %vm252_vm0, %v216_v5  ;;  %3744 = vmatprep.subr.mxu1 %v584_v18  ;;  %v231_v33 = vld [vmem:[%s4712_s9 + $0x90] sm:$0xff]  ;;  %v232_v34 = vld [vmem:[%s4712_s9 + $0x98] sm:$0xff]  ;;  %v233_v35 = vld [vmem:[%s4712_s9 + $0xa0] sm:$0xff]  ;;  %p4552_p10 = pnand %p4551_p9, %p4680_p5  ;;  %p4558_p13 = scmp.lt.s32.totalorder %s4556_s8, %s4550_s5 }
  0x31   : > { %3692 = vmatprep.mubr.msk.f32.mxu0 %vm252_vm0, %v217_v6  ;;  %3745 = vmatpush3.msra.mxu1 %v584_v18  ;;  %v234_v36 = vld [vmem:[%s4712_s9 + $0xa8] sm:$0xff]  ;;  %v235_v37 = vld [vmem:[%s4712_s9 + $0xb0] sm:$0xff]  ;;  %v236_v38 = vld [vmem:[%s4712_s9 + $0xb8] sm:$0xff] }
  0x32   : > { %3746 = vmatprep.subr.mxu1 %v583_v19  ;;  %v237_v39 = vld [vmem:[%s4712_s9 + $0xc0] sm:$0xff]  ;;  %v238_v40 = vld [vmem:[%s4712_s9 + $0xc8] sm:$0xff]  ;;  %v239_v41 = vld [vmem:[%s4712_s9 + $0xd0] sm:$0xff]  ;;  %p4553_p11 = pneg %p4552_p10  ;;  %p4559_p0 = por %p4558_p13, %p4557_p12 }
  0x33   : > { %3747 = vmatpush3.msra.mxu1 %v583_v19  ;;  %v240_v42 = vld [vmem:[%s4712_s9 + $0xd8] sm:$0xff]  ;;  %v241_v43 = vld [vmem:[%s4712_s9 + $0xe0] sm:$0xff]  ;;  %v242_v44 = vld [vmem:[%s4712_s9 + $0xe8] sm:$0xff] }
  0x34   : > { %3693 = vmatmul.mubr.msk.f32.gmra.mxu0 %vm252_vm0, %v218_v7  ;;  %3748 = vmatprep.subr.mxu1 %v582_v22  ;;  %v243_v45 = vld [vmem:[%s4712_s9 + $0xf0] sm:$0xff]  ;;  %v244_v46 = vld [vmem:[%s4712_s9 + $0xf8] sm:$0xff]  ;;  %p4560_p1 = pnand %p4559_p0, %p4553_p11 }
  0x35   : > { %3695 = vmatprep.mubr.msk.f32.mxu0 %vm252_vm0, %v219_v8  ;;  %3749 = vmatpush3.msra.mxu1 %v582_v22  ;;  %v574_v49 = vld [vmem:[#allocation2 + $0x18] sm:$0xff]  ;;  %v4778_v51 = vld [vmem:[#allocation2 + $0x10] ss:$0 sm:$0xff] }
  0x36   : > { %3750 = vmatprep.subr.mxu1 %v581_v23 }
  0x37   : > { %3751 = vmatpush3.msra.mxu1 %v581_v23 }
  0x38   : > { %3696 = vmatmul.mubr.msk.f32.gmra.mxu0 %vm252_vm0, %v220_v12  ;;  %3752 = vmatprep.subr.mxu1 %v580_v26 }
  0x39   : > { %3698 = vmatprep.mubr.msk.f32.mxu0 %vm252_vm0, %v221_v13  ;;  %3753 = vmatpush3.msra.mxu1 %v580_v26 }
  0x3a   : > { %3754 = vmatprep.subr.mxu1 %v579_v27 }
  0x3b   : > { %3755 = vmatpush3.msra.mxu1 %v579_v27 }
  0x3c   : > { %3699 = vmatmul.mubr.msk.f32.gmra.mxu0 %vm252_vm0, %v222_v16  ;;  %3756 = vmatprep.subr.mxu1 %v578_v30 }
  0x3d   : > { %3701 = vmatprep.mubr.msk.f32.mxu0 %vm252_vm0, %v223_v17  ;;  %3757 = vmatpush3.msra.mxu1 %v578_v30 }
  0x3e   : > { %3758 = vmatprep.subr.mxu1 %v577_v31 }
  0x3f   : > { %3759 = vmatpush3.msra.mxu1 %v577_v31 }
  0x40   : > { %3702 = vmatmul.mubr.msk.f32.gmra.mxu0 %vm252_vm0, %v224_v20  ;;  %3760 = vmatprep.subr.mxu1 %v576_v47 }
  0x41   : > { %3704 = vmatprep.mubr.msk.f32.mxu0 %vm252_vm0, %v225_v21  ;;  %3761 = vmatpush3.msra.mxu1 %v576_v47 }
  0x42   : > { %3762 = vmatprep.subr.mxu1 %v575_v48 }
  0x43   : > { %3763 = vmatpush3.msra.mxu1 %v575_v48 }
  0x44   : > { %3705 = vmatmul.mubr.msk.f32.gmra.mxu0 %vm252_vm0, %v226_v24  ;;  %3764 = vmatprep.subr.mxu1 %v574_v49 }
  0x45   : > { %3707 = vmatprep.mubr.msk.f32.mxu0 %vm252_vm0, %v227_v25  ;;  %3765 = vmatpush3.msra.mxu1 %v574_v49 }
  0x48   : > { %3708 = vmatmul.mubr.msk.f32.gmra.mxu0 %vm252_vm0, %v228_v28 }
  0x49   : > { %3710 = vmatprep.mubr.msk.f32.mxu0 %vm252_vm0, %v229_v29 }
  0x4c   : > { %3711 = vmatmul.mubr.msk.f32.gmra.mxu0 %vm252_vm0, %v230_v32 }
  0x4d   : > { %3713 = vmatprep.mubr.msk.f32.mxu0 %vm252_vm0, %v231_v33 }
  0x50   : > { %3714 = vmatmul.mubr.msk.f32.gmra.mxu0 %vm252_vm0, %v232_v34 }
  0x51   : > { %3716 = vmatprep.mubr.msk.f32.mxu0 %vm252_vm0, %v233_v35 }
  0x54   : > { %3717 = vmatmul.mubr.msk.f32.gmra.mxu0 %vm252_vm0, %v234_v36 }
  0x55   : > { %3719 = vmatprep.mubr.msk.f32.mxu0 %vm252_vm0, %v235_v37 }
  0x58   : > { %3720 = vmatmul.mubr.msk.f32.gmra.mxu0 %vm252_vm0, %v236_v38 }
  0x59   : > { %3722 = vmatprep.mubr.msk.f32.mxu0 %vm252_vm0, %v237_v39 }
  0x5c   : > { %3723 = vmatmul.mubr.msk.f32.gmra.mxu0 %vm252_vm0, %v238_v40 }
  0x5d   : > { %3725 = vmatprep.mubr.msk.f32.mxu0 %vm252_vm0, %v239_v41 }
  0x60   : > { %3726 = vmatmul.mubr.msk.f32.gmra.mxu0 %vm252_vm0, %v240_v42 }
  0x61   : > { %3728 = vmatprep.mubr.msk.f32.mxu0 %vm252_vm0, %v241_v43 }
  0x64   : > { %3729 = vmatmul.mubr.msk.f32.gmra.mxu0 %vm252_vm0, %v242_v44 }
  0x65   : > { %3731 = vmatprep.mubr.msk.f32.mxu0 %vm252_vm0, %v243_v45 }
  0x68   : > { %3732 = vmatmul.mubr.msk.f32.gmra.mxu0 %vm252_vm0, %v244_v46 }
  0xec   : > { %v3688_v50 = vpop.f32.mrf.mxu0 }
  0xed   : > { %v421_v54 = vadd.f32 %v3688_v50, %v4778_v51 }
  0xee   : > { %v415_v52 = vpop.f32.mrf.mxu0 }
  0xef   : > { %v416_v53 = vadd.f32 %v4778_v51, %v415_v52  ;;  %v4819_v52 = vld [vmem:[%s4816_s20] sm:$0xff]  }
  0xf0   : > { %v3691_v55 = vpop.f32.mrf.mxu0  ;;  %3830 = vmatprep.mubr.bf16.mxu0 %v4819_v52 }
  0xf1   : > { %3766 = vmatprep.mubr.f32.mxu1 %v416_v53  ;;  %v431_v58 = vadd.f32 %v3691_v55, %v4778_v51  ;;  %v4823_v53 = vld [vmem:[%s4816_s20 + $0x40] sm:$0xff]  }
  0xf2   : > { %v425_v56 = vpop.f32.mrf.mxu0  ;;  %3767 = vmatmul.mubr.f32.vlgmr.msra.gmra.mxu1 %v421_v54 }
  0xf3   : > { %v426_v57 = vadd.f32 %v4778_v51, %v425_v56 }
  0xf4   : > { %v3694_v59 = vpop.f32.mrf.mxu0 }
  0xf5   : > { %3769 = vmatprep.mubr.f32.mxu1 %v426_v57  ;;  %v441_v62 = vadd.f32 %v3694_v59, %v4778_v51 }
  0xf6   : > { %v435_v60 = vpop.f32.mrf.mxu0  ;;  %3770 = vmatmul.mubr.f32.gmra.mxu1 %v431_v58 }
  0xf7   : > { %v436_v61 = vadd.f32 %v4778_v51, %v435_v60 }
  0xf8   : > { %v3697_v63 = vpop.f32.mrf.mxu0 }
  0xf9   : > { %3772 = vmatprep.mubr.f32.mxu1 %v436_v61  ;;  %v451_v2 = vadd.f32 %v3697_v63, %v4778_v51 }
  0xfa   : > { %v445_v0 = vpop.f32.mrf.mxu0  ;;  %3773 = vmatmul.mubr.f32.gmra.mxu1 %v441_v62 }
  0xfb   : > { %v446_v1 = vadd.f32 %v4778_v51, %v445_v0 }
  0xfc   : > { %v3700_v3 = vpop.f32.mrf.mxu0 }
  0xfd   : > { %3775 = vmatprep.mubr.f32.mxu1 %v446_v1  ;;  %v461_v6 = vadd.f32 %v3700_v3, %v4778_v51  ;;  %v4830_v3 = vld [vmem:[#allocation2 + $0x98] ss:$0 sm:$0xff] }
  0xfe   : > { %v455_v4 = vpop.f32.mrf.mxu0  ;;  %3776 = vmatmul.mubr.f32.gmra.mxu1 %v451_v2 }
  0xff   : > { %v456_v5 = vadd.f32 %v4778_v51, %v455_v4 }
 0x100   : > { %v3703_v7 = vpop.f32.mrf.mxu0 }
 0x101   : > { %3778 = vmatprep.mubr.f32.mxu1 %v456_v5  ;;  %v471_v10 = vadd.f32 %v3703_v7, %v4778_v51 }
 0x102   : > { %v465_v8 = vpop.f32.mrf.mxu0  ;;  %3779 = vmatmul.mubr.f32.gmra.mxu1 %v461_v6 }
 0x103   : > { %v466_v9 = vadd.f32 %v4778_v51, %v465_v8 }
 0x104   : > { %v3706_v11 = vpop.f32.mrf.mxu0 }
 0x105   : > { %3781 = vmatprep.mubr.f32.mxu1 %v466_v9  ;;  %v481_v14 = vadd.f32 %v3706_v11, %v4778_v51 }
 0x106   : > { %v475_v12 = vpop.f32.mrf.mxu0  ;;  %3782 = vmatmul.mubr.f32.gmra.mxu1 %v471_v10 }
 0x107   : > { %v476_v13 = vadd.f32 %v4778_v51, %v475_v12 }
 0x108   : > { %v3709_v15 = vpop.f32.mrf.mxu0 }
 0x109   : > { %3784 = vmatprep.mubr.f32.mxu1 %v476_v13  ;;  %v491_v18 = vadd.f32 %v3709_v15, %v4778_v51 }
 0x10a   : > { %v485_v16 = vpop.f32.mrf.mxu0  ;;  %3785 = vmatmul.mubr.f32.gmra.mxu1 %v481_v14 }
 0x10b   : > { %v486_v17 = vadd.f32 %v4778_v51, %v485_v16 }
 0x10c   : > { %v3712_v19 = vpop.f32.mrf.mxu0 }
 0x10d   : > { %3787 = vmatprep.mubr.f32.mxu1 %v486_v17  ;;  %v501_v22 = vadd.f32 %v3712_v19, %v4778_v51 }
 0x10e   : > { %v495_v20 = vpop.f32.mrf.mxu0  ;;  %3788 = vmatmul.mubr.f32.gmra.mxu1 %v491_v18 }
 0x10f   : > { %v496_v21 = vadd.f32 %v4778_v51, %v495_v20 }
 0x110   : > { %v3715_v23 = vpop.f32.mrf.mxu0 }
 0x111   : > { %3790 = vmatprep.mubr.f32.mxu1 %v496_v21  ;;  %v511_v26 = vadd.f32 %v3715_v23, %v4778_v51 }
 0x112   : > { %v505_v24 = vpop.f32.mrf.mxu0  ;;  %3791 = vmatmul.mubr.f32.gmra.mxu1 %v501_v22 }
 0x113   : > { %v506_v25 = vadd.f32 %v4778_v51, %v505_v24 }
 0x114   : > { %v3718_v27 = vpop.f32.mrf.mxu0 }
 0x115   : > { %3793 = vmatprep.mubr.f32.mxu1 %v506_v25  ;;  %v521_v30 = vadd.f32 %v3718_v27, %v4778_v51 }
 0x116   : > { %v515_v28 = vpop.f32.mrf.mxu0  ;;  %3794 = vmatmul.mubr.f32.gmra.mxu1 %v511_v26 }
 0x117   : > { %v516_v29 = vadd.f32 %v4778_v51, %v515_v28 }
 0x118   : > { %v3721_v31 = vpop.f32.mrf.mxu0 }
 0x119   : > { %3796 = vmatprep.mubr.f32.mxu1 %v516_v29  ;;  %v531_v34 = vadd.f32 %v3721_v31, %v4778_v51 }
 0x11a   : > { %v525_v32 = vpop.f32.mrf.mxu0  ;;  %3797 = vmatmul.mubr.f32.gmra.mxu1 %v521_v30 }
 0x11b   : > { %v526_v33 = vadd.f32 %v4778_v51, %v525_v32 }
 0x11c   : > { %v3724_v35 = vpop.f32.mrf.mxu0 }
 0x11d   : > { %3799 = vmatprep.mubr.f32.mxu1 %v526_v33  ;;  %v541_v38 = vadd.f32 %v3724_v35, %v4778_v51 }
 0x11e   : > { %v535_v36 = vpop.f32.mrf.mxu0  ;;  %3800 = vmatmul.mubr.f32.gmra.mxu1 %v531_v34 }
 0x11f   : > { %v536_v37 = vadd.f32 %v4778_v51, %v535_v36 }
 0x120   : > { %v3727_v39 = vpop.f32.mrf.mxu0 }
 0x121   : > { %3802 = vmatprep.mubr.f32.mxu1 %v536_v37  ;;  %v551_v42 = vadd.f32 %v3727_v39, %v4778_v51 }
 0x122   : > { %v545_v40 = vpop.f32.mrf.mxu0  ;;  %3803 = vmatmul.mubr.f32.gmra.mxu1 %v541_v38 }
 0x123   : > { %v546_v41 = vadd.f32 %v4778_v51, %v545_v40 }
 0x124   : > { %v3730_v43 = vpop.f32.mrf.mxu0 }
 0x125   : > { %3805 = vmatprep.mubr.f32.mxu1 %v546_v41  ;;  %v561_v46 = vadd.f32 %v3730_v43, %v4778_v51 }
 0x126   : > { %v555_v44 = vpop.f32.mrf.mxu0  ;;  %3806 = vmatmul.mubr.f32.gmra.mxu1 %v551_v42 }
 0x127   : > { %v556_v45 = vadd.f32 %v4778_v51, %v555_v44 }
 0x128   : > { %v3733_v47 = vpop.f32.mrf.mxu0 }
 0x129   : > { %3808 = vmatprep.mubr.f32.mxu1 %v556_v45  ;;  %v571_v50 = vadd.f32 %v3733_v47, %v4778_v51 }
 0x12a   : > { %v565_v48 = vpop.f32.mrf.mxu0  ;;  %3809 = vmatmul.mubr.f32.gmra.mxu1 %v561_v46 }
 0x12b   : > { %v566_v49 = vadd.f32 %v4778_v51, %v565_v48 }
 0x12d   : > { %3811 = vmatprep.mubr.f32.mxu1 %v566_v49 }
 0x12e   : > { %3812 = vmatmul.mubr.f32.gmra.mxu1 %v571_v50 }
 0x12f   : > { %3862 = vmatprep.mubr.bf16.mxu1 %v4823_v53 }
 0x1b2   : > { %v4826_v51 = vpop.f32.mrf.mxu1 }
 0x1b4   : > { %v4828_v54 = vpop.f32.mrf.mxu1 }
 0x1b5   : > { %v4924_v48 = vadd.f32 %v4830_v3, %v4828_v54 }
 0x1b6   : > { %v3771_v55 = vpop.f32.mrf.mxu1 }
 0x1b7   : > { %v4919_v45 = vadd.f32 %v3771_v55, %v4830_v3  ;;  %v4933_v55 = vadd.f32 %v4826_v51, %v4830_v3  ;;  %v820_v54 = vmax.f32 %v4924_v48, 0.0 }
 0x1b8   : > { %v671_v56 = vpop.f32.mrf.mxu1 }
 0x1b9   : > { %v4911_v41 = vadd.f32 %v4830_v3, %v671_v56 }
 0x1ba   : > { %v3774_v57 = vpop.f32.mrf.mxu1 }
 0x1bb   : > { %v4907_v38 = vadd.f32 %v3774_v57, %v4830_v3  ;;  %v822_v49 = vmax.f32 %v4911_v41, 0.0  ;;  %v823_v57 = vmax.f32 %v4919_v45, 0.0 }
 0x1bc   : > { %v681_v58 = vpop.f32.mrf.mxu1 }
 0x1bd   : > { %v4897_v34 = vadd.f32 %v4830_v3, %v681_v58  ;;  %v825_v46 = vmax.f32 %v4907_v38, 0.0 }
 0x1be   : > { %v3777_v59 = vpop.f32.mrf.mxu1 }
 0x1bf   : > { %v4891_v31 = vadd.f32 %v3777_v59, %v4830_v3  ;;  %v824_v42 = vmax.f32 %v4897_v34, 0.0  ;;  %v886_v59 = vpack.c.bf16 %v823_v57, %v822_v49 }
 0x1c0   : > { %v691_v60 = vpop.f32.mrf.mxu1 }
 0x1c1   : > { %v4881_v27 = vadd.f32 %v4830_v3, %v691_v60  ;;  %v827_v39 = vmax.f32 %v4891_v31, 0.0  ;;  %v887_v50 = vpack.c.bf16 %v825_v46, %v824_v42 }
 0x1c2   : > { %v3780_v61 = vpop.f32.mrf.mxu1 }
 0x1c3   : > { %v4875_v24 = vadd.f32 %v3780_v61, %v4830_v3  ;;  %v826_v35 = vmax.f32 %v4881_v27, 0.0  ;;  %v821_v61 = vmax.f32 %v4933_v55, 0.0 }
 0x1c4   : > { %v701_v62 = vpop.f32.mrf.mxu1 }
 0x1c5   : > { %v4865_v20 = vadd.f32 %v4830_v3, %v701_v62  ;;  %v5861_v32 = vmax.f32 %v4875_v24, 0.0  ;;  %v888_v43 = vpack.c.bf16 %v827_v39, %v826_v35  ;;  %v5884_v41 = vmax.f32 %v4875_v24, 0.0 }
 0x1c6   : > { %v3783_v63 = vpop.f32.mrf.mxu1 }
 0x1c7   : > { %v4855_v16 = vadd.f32 %v3783_v63, %v4830_v3  ;;  %v828_v28 = vmax.f32 %v4865_v20, 0.0 }
 0x1c8   : > { %v711_v0 = vpop.f32.mrf.mxu1 }
 0x1c9   : > { %v4847_v11 = vadd.f32 %v4830_v3, %v711_v0  ;;  %v5859_v25 = vmax.f32 %v4855_v16, 0.0  ;;  %v889_v36 = vpack.c.bf16 %v5861_v32, %v828_v28  ;;  %v885_v0 = vpack.c.bf16 %v821_v61, %v820_v54  ;;  %v854_v32 = vld [vmem:[#allocation2 + $0xb0] sm:$0xff] }
 0x1ca   : > { %v3786_v1 = vpop.f32.mrf.mxu1 }
 0x1cb   : > { %v4839_v8 = vadd.f32 %v3786_v1, %v4830_v3  ;;  %v5860_v21 = vmax.f32 %v4847_v11, 0.0  ;;  %v5885_v34 = vmax.f32 %v4847_v11, 0.0 }
 0x1cc   : > { %v721_v2 = vpop.f32.mrf.mxu1 }
 0x1cd   : > { %v4833_v5 = vadd.f32 %v4830_v3, %v721_v2  ;;  %v5849_v17 = vmax.f32 %v4839_v8, 0.0  ;;  %v890_v29 = vpack.c.bf16 %v5859_v25, %v5860_v21  ;;  %v5098_v25 = vld [vmem:[%s4816_s20 + $0x70] sm:$0xff]   ;;  %v5103_v21 = vld [vmem:[%s4816_s20 + $0x78] sm:$0xff]   ;;  %v5888_v27 = vmax.f32 %v4839_v8, 0.0 }
 0x1ce   : > { %v3789_v4 = vpop.f32.mrf.mxu1 }
 0x1cf   : > { %v4836_v6 = vadd.f32 %v3789_v4, %v4830_v3  ;;  %v5852_v12 = vmax.f32 %v4833_v5, 0.0  ;;  %v5887_v38 = vmax.f32 %v4833_v5, 0.0 }
 0x1d0   : > { %v731_v7 = vpop.f32.mrf.mxu1 }
 0x1d1   : > { %v4842_v9 = vadd.f32 %v4830_v3, %v731_v7  ;;  %v5843_v13 = vmax.f32 %v4836_v6, 0.0  ;;  %v891_v22 = vpack.c.bf16 %v5849_v17, %v5852_v12  ;;  %v5041_v17 = vld [vmem:[%s4816_s20 + $0x30] sm:$0xff]   ;;  %v5890_v20 = vmax.f32 %v4836_v6, 0.0 }
 0x1d2   : > { %v4844_v10 = vpop.f32.mrf.mxu1 }
 0x1d3   : > { %v5846_v14 = vmax.f32 %v4842_v9, 0.0  ;;  %v5889_v31 = vmax.f32 %v4842_v9, 0.0 }
 0x1d4   : > { %v4852_v15 = vpop.f32.mrf.mxu1 }
 0x1d5   : > { %v892_v18 = vpack.c.bf16 %v5843_v13, %v5846_v14  ;;  %v5005_v13 = vld [vmem:[%s4816_s20 + $0x20] sm:$0xff]  }
 0x1d6   : > { %v4862_v19 = vpop.f32.mrf.mxu1 }
 0x1d7   : > { %3814 = vmatprep.subr.bf16.mxu0 %v892_v18 }
 0x1d8   : > { %v4872_v23 = vpop.f32.mrf.mxu1  ;;  %3815 = vmatpush3.bf16.msra.mxu0 %v892_v18 }
 0x1d9   : > { %3816 = vmatprep.subr.bf16.mxu0 %v891_v22  ;;  %v5030_v14 = vadd.f32 %v4830_v3, %v4872_v23 }
 0x1da   : > { %v4878_v26 = vpop.f32.mrf.mxu1 }
 0x1dc   : > { %v4888_v30 = vpop.f32.mrf.mxu1  ;;  %3817 = vmatpush3.bf16.msra.mxu0 %v891_v22 }
 0x1dd   : > { %3818 = vmatprep.subr.bf16.mxu0 %v890_v29 }
 0x1de   : > { %v4894_v33 = vpop.f32.mrf.mxu1 }
 0x1e0   : > { %v4904_v37 = vpop.f32.mrf.mxu1  ;;  %3819 = vmatpush3.bf16.msra.mxu0 %v890_v29 }
 0x1e1   : > { %3820 = vmatprep.subr.bf16.mxu0 %v889_v36 }
 0x1e2   : > { %v3804_v40 = vpop.f32.mrf.mxu1 }
 0x1e4   : > { %v781_v44 = vpop.f32.mrf.mxu1  ;;  %3821 = vmatpush3.bf16.msra.mxu0 %v889_v36  ;;  %v4965_v36 = vld [vmem:[%s4816_s20 + $0x8] sm:$0xff]  }
 0x1e5   : > { %3822 = vmatprep.subr.bf16.mxu0 %v888_v43 }
 0x1e6   : > { %v3807_v47 = vpop.f32.mrf.mxu1 }
 0x1e8   : > { %v791_v56 = vpop.f32.mrf.mxu1  ;;  %3823 = vmatpush3.bf16.msra.mxu0 %v888_v43  ;;  %v883_v43 = vld [vmem:[#allocation2 + $0x198] sm:$0xff] }
 0x1e9   : > { %3824 = vmatprep.subr.bf16.mxu0 %v887_v50  ;;  %v4959_v7 = vadd.f32 %v4830_v3, %v791_v56 }
 0x1ea   : > { %v3810_v58 = vpop.f32.mrf.mxu1 }
 0x1eb   : > { %v4953_v2 = vadd.f32 %v3810_v58, %v4830_v3  ;;  %v4971_v58 = vadd.f32 %v3807_v47, %v4830_v3 }
 0x1ec   : > { %v801_v60 = vpop.f32.mrf.mxu1  ;;  %3825 = vmatpush3.bf16.msra.mxu0 %v887_v50  ;;  %v4968_v50 = vld [vmem:[%s4816_s20 + $0x10] sm:$0xff]  }
 0x1ed   : > { %3826 = vmatprep.subr.bf16.mxu0 %v886_v59  ;;  %v4943_v51 = vadd.f32 %v4830_v3, %v801_v60  ;;  %v4979_v60 = vadd.f32 %v4830_v3, %v781_v44  ;;  %v5844_v44 = vmax.f32 %v4971_v58, 0.0  ;;  %v5902_v45 = vmax.f32 %v4971_v58, 0.0 }
 0x1ee   : > { %v3813_v62 = vpop.f32.mrf.mxu1  ;;  %v5904_v48 = vmax.f32 %v4953_v2, 0.0 }
 0x1ef   : > { %v4946_v63 = vadd.f32 %v3813_v62, %v4830_v3  ;;  %v5842_v18 = vmax.f32 %v4943_v51, 0.0  ;;  %v5845_v62 = vmax.f32 %v4959_v7, 0.0 }
 0x1f0   : > { %v811_v1 = vpop.f32.mrf.mxu1  ;;  %3827 = vmatpush3.bf16.msra.mxu0 %v886_v59  ;;  %v5841_v59 = vmax.f32 %v4953_v2, 0.0 }
 0x1f1   : > { %v4956_v4 = vadd.f32 %v4830_v3, %v811_v1  ;;  %3828 = vmatprep.subr.bf16.mxu0 %v885_v0  ;;  %v5839_v22 = vmax.f32 %v4946_v63, 0.0  ;;  %v4989_v1 = vadd.f32 %v3804_v40, %v4830_v3  ;;  %v880_v40 = vld [vmem:[#allocation2 + $0x180] sm:$0xff]  ;;  %v5906_v55 = vmax.f32 %v4946_v63, 0.0 }
 0x1f2   : > { %v899_v47 = vpack.c.bf16 %v5841_v59, %v5842_v18  ;;  %v5848_v59 = vmax.f32 %v4979_v60, 0.0  ;;  %v5002_v18 = vld [vmem:[%s4816_s20 + $0x18] sm:$0xff]  }
 0x1f3   : > { %v5840_v29 = vmax.f32 %v4956_v4, 0.0 }
 0x1f4   : > { %3829 = vmatpush3.bf16.msra.mxu0 %v885_v0  ;;  %v882_v0 = vld [vmem:[#allocation2 + $0x190] sm:$0xff] }
 0x1f5   : > { %v900_v56 = vpack.c.bf16 %v5839_v22, %v5840_v29  ;;  %3878 = vmatprep.subr.mxu0 %v883_v43  ;;  %v881_v22 = vld [vmem:[#allocation2 + $0x188] sm:$0xff]  ;;  %v4994_v29 = vadd.f32 %v4830_v3, %v4904_v37  ;;  %v5847_v37 = vmax.f32 %v4989_v1, 0.0 }
 0x1f7   : > { %3831 = vmatmul.mubr.bf16.vlgmr.msra.gmra.mxu0 %v4965_v36  ;;  %3846 = vmatprep.subr.bf16.mxu1 %v900_v56  ;;  %v5897_v6 = vmax.f32 %v4994_v29, 0.0 }
 0x1f8   : > { %3847 = vmatpush3.bf16.msra.mxu1 %v900_v56  ;;  %3834 = vmatprep.mubr.bf16.mxu0 %v4968_v50  ;;  %v898_v56 = vpack.c.bf16 %v5844_v44, %v5845_v62  ;;  %v5014_v44 = vadd.f32 %v4830_v3, %v4888_v30  ;;  %v878_v62 = vld [vmem:[#allocation2 + $0x170] sm:$0xff] }
 0x1f9   : > { %3848 = vmatprep.subr.bf16.mxu1 %v899_v47  ;;  %3879 = vmatpush3.msra.mxu0 %v883_v43  ;;  %v5009_v43 = vadd.f32 %v4894_v33, %v4830_v3  ;;  %v897_v33 = vpack.c.bf16 %v5847_v37, %v5848_v59  ;;  %v5038_v59 = vld [vmem:[%s4816_s20 + $0x28] sm:$0xff]  }
 0x1fa   : > { %3880 = vmatprep.subr.mxu0 %v882_v0  ;;  %v5854_v37 = vmax.f32 %v5014_v44, 0.0  ;;  %v5895_v8 = vmax.f32 %v5014_v44, 0.0 }
 0x1fb   : > { %3881 = vmatpush3.msra.mxu0 %v882_v0  ;;  %v5851_v0 = vmax.f32 %v4994_v29, 0.0  ;;  %v5850_v30 = vmax.f32 %v5009_v43, 0.0 }
 0x1fc   : > { %3849 = vmatpush3.bf16.msra.mxu1 %v899_v47  ;;  %3882 = vmatprep.subr.mxu0 %v881_v22  ;;  %v879_v47 = vld [vmem:[#allocation2 + $0x178] sm:$0xff] }
 0x1fd   : > { %3850 = vmatprep.subr.bf16.mxu1 %v898_v56  ;;  %3883 = vmatpush3.msra.mxu0 %v881_v22  ;;  %v5025_v22 = vadd.f32 %v4878_v26, %v4830_v3  ;;  %v877_v26 = vld [vmem:[#allocation2 + $0x168] sm:$0xff] }
 0x1fe   : > { %3884 = vmatprep.subr.mxu0 %v880_v40 }
 0x1ff   : > { %3835 = vmatmul.mubr.bf16.gmra.mxu0 %v5002_v18  ;;  %v5853_v23 = vmax.f32 %v5025_v22, 0.0  ;;  %v5896_v9 = vmax.f32 %v5025_v22, 0.0 }
 0x200   : > { %3851 = vmatpush3.bf16.msra.mxu1 %v898_v56  ;;  %3838 = vmatprep.mubr.bf16.mxu0 %v5005_v13  ;;  %v896_v56 = vpack.c.bf16 %v5850_v30, %v5851_v0  ;;  %v5050_v30 = vadd.f32 %v4830_v3, %v4852_v15  ;;  %v875_v0 = vld [vmem:[#allocation2 + $0x158] sm:$0xff] }
 0x201   : > { %3852 = vmatprep.subr.bf16.mxu1 %v897_v33  ;;  %3885 = vmatpush3.msra.mxu0 %v880_v40  ;;  %v5045_v40 = vadd.f32 %v4862_v19, %v4830_v3  ;;  %v895_v19 = vpack.c.bf16 %v5853_v23, %v5854_v37  ;;  %v874_v37 = vld [vmem:[#allocation2 + $0x150] sm:$0xff] }
 0x202   : > { %3886 = vmatprep.subr.mxu0 %v879_v47  ;;  %v5858_v12 = vmax.f32 %v5050_v30, 0.0  ;;  %v5891_v24 = vmax.f32 %v5050_v30, 0.0 }
 0x203   : > { %3887 = vmatpush3.msra.mxu0 %v879_v47  ;;  %v5856_v47 = vmax.f32 %v5030_v14, 0.0  ;;  %v5855_v15 = vmax.f32 %v5045_v40, 0.0  ;;  %v5894_v5 = vmax.f32 %v5045_v40, 0.0 }
 0x204   : > { %3853 = vmatpush3.bf16.msra.mxu1 %v897_v33  ;;  %3888 = vmatprep.subr.mxu0 %v878_v62  ;;  %v876_v33 = vld [vmem:[#allocation2 + $0x160] sm:$0xff] }
 0x205   : > { %3854 = vmatprep.subr.bf16.mxu1 %v896_v56  ;;  %3889 = vmatpush3.msra.mxu0 %v878_v62  ;;  %v5061_v62 = vadd.f32 %v4844_v10, %v4830_v3  ;;  %v894_v23 = vpack.c.bf16 %v5855_v15, %v5856_v47  ;;  %v873_v10 = vld [vmem:[#allocation2 + $0x148] sm:$0xff]  ;;  %v871_v15 = vld [vmem:[#allocation2 + $0x138] sm:$0xff] }
 0x206   : > { %3890 = vmatprep.subr.mxu0 %v877_v26  ;;  %v5079_v47 = vld [vmem:[%s4816_s20 + $0x48] sm:$0xff]  }
 0x207   : > { %3839 = vmatmul.mubr.bf16.gmra.mxu0 %v5038_v59  ;;  %v5857_v3 = vmax.f32 %v5061_v62, 0.0  ;;  %v5892_v11 = vmax.f32 %v5061_v62, 0.0 }
 0x208   : > { %3855 = vmatpush3.bf16.msra.mxu1 %v896_v56  ;;  %3842 = vmatprep.mubr.bf16.mxu0 %v5041_v17  ;;  %v5070_v56 = vld [vmem:[%s4816_s20 + $0x38] sm:$0xff]  }
 0x209   : > { %3856 = vmatprep.subr.bf16.mxu1 %v895_v19  ;;  %3891 = vmatpush3.msra.mxu0 %v877_v26  ;;  %v893_v26 = vpack.c.bf16 %v5857_v3, %v5858_v12  ;;  %v866_v3 = vld [vmem:[#allocation2 + $0x110] sm:$0xff]  ;;  %v5095_v12 = vld [vmem:[%s4816_s20 + $0x68] sm:$0xff]  }
 0x20a   : > { %3892 = vmatprep.subr.mxu0 %v876_v33 }
 0x20b   : > { %3893 = vmatpush3.msra.mxu0 %v876_v33  ;;  %v872_v33 = vld [vmem:[#allocation2 + $0x140] sm:$0xff] }
 0x20c   : > { %3857 = vmatpush3.bf16.msra.mxu1 %v895_v19  ;;  %3894 = vmatprep.subr.mxu0 %v875_v0  ;;  %v867_v19 = vld [vmem:[#allocation2 + $0x118] sm:$0xff] }
 0x20d   : > { %3858 = vmatprep.subr.bf16.mxu1 %v894_v23  ;;  %3895 = vmatpush3.msra.mxu0 %v875_v0  ;;  %v5082_v0 = vld [vmem:[%s4816_s20 + $0x50] sm:$0xff]  }
 0x20e   : > { %3896 = vmatprep.subr.mxu0 %v874_v37 }
 0x20f   : > { %3843 = vmatmul.mubr.bf16.gmra.mxu0 %v5070_v56 }
 0x210   : > { %3859 = vmatpush3.bf16.msra.mxu1 %v894_v23  ;;  %3897 = vmatpush3.msra.mxu0 %v874_v37  ;;  %v865_v37 = vld [vmem:[#allocation2 + $0x108] sm:$0xff]  ;;  %v864_v23 = vld [vmem:[#allocation2 + $0x100] sm:$0xff] }
 0x211   : > { %3860 = vmatprep.subr.bf16.mxu1 %v893_v26  ;;  %3898 = vmatprep.subr.mxu0 %v873_v10 }
 0x212   : > { %3899 = vmatpush3.msra.mxu0 %v873_v10  ;;  %v5087_v10 = vld [vmem:[%s4816_s20 + $0x58] sm:$0xff]  }
 0x213   : > { %3900 = vmatprep.subr.mxu0 %v872_v33 }
 0x214   : > { %3861 = vmatpush3.bf16.msra.mxu1 %v893_v26  ;;  %3901 = vmatpush3.msra.mxu0 %v872_v33  ;;  %v863_v26 = vld [vmem:[#allocation2 + $0xf8] sm:$0xff]  ;;  %v5090_v33 = vld [vmem:[%s4816_s20 + $0x60] sm:$0xff]  }
 0x215   : > { %3958 = vmatprep.subr.mxu1 %v867_v19  ;;  %3902 = vmatprep.subr.mxu0 %v871_v15 }
 0x216   : > { %3903 = vmatpush3.msra.mxu0 %v871_v15  ;;  %v862_v15 = vld [vmem:[#allocation2 + $0xf0] sm:$0xff] }
 0x217   : > { %3863 = vmatmul.mubr.bf16.vlgmr.msra.gmra.mxu1 %v5079_v47 }
 0x218   : > { %3959 = vmatpush3.msra.mxu1 %v867_v19  ;;  %3866 = vmatprep.mubr.bf16.mxu1 %v5082_v0  ;;  %v861_v19 = vld [vmem:[#allocation2 + $0xe8] sm:$0xff] }
 0x219   : > { %3960 = vmatprep.subr.mxu1 %v866_v3 }
 0x21a   : > { %3961 = vmatpush3.msra.mxu1 %v866_v3  ;;  %v860_v3 = vld [vmem:[#allocation2 + $0xe0] sm:$0xff] }
 0x21b   : > { %3962 = vmatprep.subr.mxu1 %v865_v37 }
 0x21c   : > { %3963 = vmatpush3.msra.mxu1 %v865_v37  ;;  %v859_v37 = vld [vmem:[#allocation2 + $0xd8] sm:$0xff] }
 0x21d   : > { %3964 = vmatprep.subr.mxu1 %v864_v23 }
 0x21e   : > { %3965 = vmatpush3.msra.mxu1 %v864_v23  ;;  %v858_v23 = vld [vmem:[#allocation2 + $0xd0] sm:$0xff] }
 0x21f   : > { %3867 = vmatmul.mubr.bf16.gmra.mxu1 %v5087_v10  ;;  %3966 = vmatprep.subr.mxu1 %v863_v26 }
 0x220   : > { %3967 = vmatpush3.msra.mxu1 %v863_v26  ;;  %3870 = vmatprep.mubr.bf16.mxu1 %v5090_v33  ;;  %v857_v26 = vld [vmem:[#allocation2 + $0xc8] sm:$0xff] }
 0x221   : > { %3968 = vmatprep.subr.mxu1 %v862_v15 }
 0x222   : > { %3969 = vmatpush3.msra.mxu1 %v862_v15  ;;  %v856_v15 = vld [vmem:[#allocation2 + $0xc0] sm:$0xff] }
 0x223   : > { %3970 = vmatprep.subr.mxu1 %v861_v19 }
 0x224   : > { %3971 = vmatpush3.msra.mxu1 %v861_v19  ;;  %v855_v19 = vld [vmem:[#allocation2 + $0xb8] sm:$0xff] }
 0x225   : > { %3972 = vmatprep.subr.mxu1 %v860_v3 }
 0x226   : > { %3973 = vmatpush3.msra.mxu1 %v860_v3  ;;  %v853_v3 = vld [vmem:[#allocation2 + $0xa8] sm:$0xff] }
 0x227   : > { %3871 = vmatmul.mubr.bf16.gmra.mxu1 %v5095_v12  ;;  %3974 = vmatprep.subr.mxu1 %v859_v37 }
 0x228   : > { %3975 = vmatpush3.msra.mxu1 %v859_v37  ;;  %3874 = vmatprep.mubr.bf16.mxu1 %v5098_v25  ;;  %v852_v37 = vld [vmem:[#allocation2 + $0xa0] sm:$0xff] }
 0x229   : > { %3976 = vmatprep.subr.mxu1 %v858_v23 }
 0x22a   : > { %3977 = vmatpush3.msra.mxu1 %v858_v23  ;;  %v870_v23 = vld [vmem:[#allocation2 + $0x130] sm:$0xff] }
 0x22b   : > { %3978 = vmatprep.subr.mxu1 %v857_v26  ;;  %3904 = vmatprep.subr.mxu0 %v870_v23 }
 0x22c   : > { %3979 = vmatpush3.msra.mxu1 %v857_v26  ;;  %3905 = vmatpush3.msra.mxu0 %v870_v23  ;;  %v869_v26 = vld [vmem:[#allocation2 + $0x128] sm:$0xff] }
 0x22d   : > { %3980 = vmatprep.subr.mxu1 %v856_v15  ;;  %3906 = vmatprep.subr.mxu0 %v869_v26 }
 0x22e   : > { %3981 = vmatpush3.msra.mxu1 %v856_v15  ;;  %3907 = vmatpush3.msra.mxu0 %v869_v26 }
 0x22f   : > { %3875 = vmatmul.mubr.bf16.gmra.mxu1 %v5103_v21  ;;  %3982 = vmatprep.subr.mxu1 %v855_v19 }
 0x230   : > { %3983 = vmatpush3.msra.mxu1 %v855_v19  ;;  %3990 = vmatprep.mubr.f32.mxu1 %v820_v54 }
 0x231   : > { %3984 = vmatprep.subr.mxu1 %v854_v32 }
 0x232   : > { %3985 = vmatpush3.msra.mxu1 %v854_v32  ;;  %v868_v32 = vld [vmem:[#allocation2 + $0x120] sm:$0xff] }
 0x233   : > { %3986 = vmatprep.subr.mxu1 %v853_v3  ;;  %3908 = vmatprep.subr.mxu0 %v868_v32 }
 0x234   : > { %3987 = vmatpush3.msra.mxu1 %v853_v3  ;;  %3909 = vmatpush3.msra.mxu0 %v868_v32 }
 0x235   : > { %3988 = vmatprep.subr.mxu1 %v852_v37 }
 0x236   : > { %3989 = vmatpush3.msra.mxu1 %v852_v37 }
 0x237   : > { %3991 = vmatmul.mubr.f32.vlgmr.msra.gmra.mxu1 %v821_v61 }
 0x238   : > { %3993 = vmatprep.mubr.f32.mxu1 %v822_v49  ;;  %v5905_v49 = vmax.f32 %v4956_v4, 0.0 }
 0x23b   : > { %3994 = vmatmul.mubr.f32.gmra.mxu1 %v823_v57 }
 0x23c   : > { %3996 = vmatprep.mubr.f32.mxu1 %v824_v42  ;;  %v5886_v42 = vmax.f32 %v4855_v16, 0.0  ;;  %v5893_v16 = vmax.f32 %v5030_v14, 0.0  ;;  %v5900_v14 = vmax.f32 %v4989_v1, 0.0 }
 0x23f   : > { %3997 = vmatmul.mubr.f32.gmra.mxu1 %v825_v46  ;;  %v5903_v46 = vmax.f32 %v4943_v51, 0.0 }
 0x240   : > { %3999 = vmatprep.mubr.f32.mxu1 %v826_v35  ;;  %v5899_v35 = vmax.f32 %v4979_v60, 0.0 }
 0x243   : > { %4000 = vmatmul.mubr.f32.gmra.mxu1 %v827_v39  ;;  %v5901_v39 = vmax.f32 %v4959_v7, 0.0 }
 0x244   : > { %4002 = vmatprep.mubr.f32.mxu1 %v828_v28  ;;  %v5898_v28 = vmax.f32 %v5009_v43, 0.0 }
 0x247   : > { %4003 = vmatmul.mubr.f32.gmra.mxu1 %v5884_v41 }
 0x248   : > { %4005 = vmatprep.mubr.f32.mxu1 %v5885_v34 }
 0x24b   : > { %4006 = vmatmul.mubr.f32.gmra.mxu1 %v5886_v42 }
 0x24c   : > { %4008 = vmatprep.mubr.f32.mxu1 %v5887_v38 }
 0x24f   : > { %4009 = vmatmul.mubr.f32.gmra.mxu1 %v5888_v27 }
 0x250   : > { %4011 = vmatprep.mubr.f32.mxu1 %v5889_v31 }
 0x253   : > { %4012 = vmatmul.mubr.f32.gmra.mxu1 %v5890_v20 }
 0x254   : > { %4014 = vmatprep.mubr.f32.mxu1 %v5891_v24 }
 0x257   : > { %4015 = vmatmul.mubr.f32.gmra.mxu1 %v5892_v11 }
 0x258   : > { %4017 = vmatprep.mubr.f32.mxu1 %v5893_v16 }
 0x25b   : > { %4018 = vmatmul.mubr.f32.gmra.mxu1 %v5894_v5 }
 0x25c   : > { %4020 = vmatprep.mubr.f32.mxu1 %v5895_v8 }
 0x25f   : > { %4021 = vmatmul.mubr.f32.gmra.mxu1 %v5896_v9 }
 0x260   : > { %4023 = vmatprep.mubr.f32.mxu1 %v5897_v6 }
 0x263   : > { %4024 = vmatmul.mubr.f32.gmra.mxu1 %v5898_v28 }
 0x264   : > { %4026 = vmatprep.mubr.f32.mxu1 %v5899_v35 }
 0x267   : > { %4027 = vmatmul.mubr.f32.gmra.mxu1 %v5900_v14 }
 0x268   : > { %4029 = vmatprep.mubr.f32.mxu1 %v5901_v39 }
 0x26b   : > { %4030 = vmatmul.mubr.f32.gmra.mxu1 %v5902_v45 }
 0x26c   : > { %4032 = vmatprep.mubr.f32.mxu1 %v5903_v46 }
 0x26f   : > { %4033 = vmatmul.mubr.f32.gmra.mxu1 %v5904_v48 }
 0x270   : > { %4035 = vmatprep.mubr.f32.mxu1 %v5905_v49 }
 0x273   : > { %4036 = vmatmul.mubr.f32.gmra.mxu1 %v5906_v55 }
 0x274   : > { %4086 = vmatprep.mubr.bf16.mxu1 %v4823_v53 }
 0x2b7   : > { %v3832_v57 = vpop.f32.mrf.mxu0 }
 0x2b9   : > { %v999_v54 = vpop.f32.mrf.mxu0 }
 0x2ba   : > { %3910 = vmatprep.mubr.f32.mxu0 %v999_v54 }
 0x2bb   : > { %v3833_v61 = vpop.f32.mrf.mxu0 }
 0x2bd   : > { %v1002_v7 = vpop.f32.mrf.mxu0 }
 0x2be   : > { %3911 = vmatmul.mubr.f32.vlgmr.msra.gmra.mxu0 %v1002_v7 }
 0x2bf   : > { %v3836_v29 = vpop.f32.mrf.mxu0  ;;  %3913 = vmatprep.mubr.f32.mxu0 %v3832_v57 }
 0x2c1   : > { %v1015_v51 = vpop.f32.mrf.mxu0 }
 0x2c2   : > { %3914 = vmatmul.mubr.f32.gmra.mxu0 %v3833_v61 }
 0x2c3   : > { %v3837_v2 = vpop.f32.mrf.mxu0  ;;  %3916 = vmatprep.mubr.f32.mxu0 %v1015_v51 }
 0x2c5   : > { %v1018_v58 = vpop.f32.mrf.mxu0 }
 0x2c6   : > { %3917 = vmatmul.mubr.f32.gmra.mxu0 %v1018_v58 }
 0x2c7   : > { %v3840_v4 = vpop.f32.mrf.mxu0  ;;  %3919 = vmatprep.mubr.f32.mxu0 %v3836_v29 }
 0x2c9   : > { %v1031_v63 = vpop.f32.mrf.mxu0 }
 0x2ca   : > { %3920 = vmatmul.mubr.f32.gmra.mxu0 %v3837_v2 }
 0x2cb   : > { %v3841_v60 = vpop.f32.mrf.mxu0  ;;  %3922 = vmatprep.mubr.f32.mxu0 %v1031_v63 }
 0x2cd   : > { %v1034_v53 = vpop.f32.mrf.mxu0 }
 0x2ce   : > { %3923 = vmatmul.mubr.f32.gmra.mxu0 %v1034_v53 }
 0x2cf   : > { %v3844_v1 = vpop.f32.mrf.mxu0  ;;  %3925 = vmatprep.mubr.f32.mxu0 %v3840_v4 }
 0x2d1   : > { %v1047_v44 = vpop.f32.mrf.mxu0 }
 0x2d2   : > { %3926 = vmatmul.mubr.f32.gmra.mxu0 %v3841_v60 }
 0x2d3   : > { %v3845_v43 = vpop.f32.mrf.mxu0  ;;  %3928 = vmatprep.mubr.f32.mxu0 %v1047_v44 }
 0x2d5   : > { %v1050_v22 = vpop.f32.mrf.mxu0 }
 0x2d6   : > { %3929 = vmatmul.mubr.f32.gmra.mxu0 %v1050_v22 }
 0x2d7   : > { %v3864_v30 = vpop.f32.mrf.mxu1  ;;  %3931 = vmatprep.mubr.f32.mxu0 %v3844_v1 }
 0x2d9   : > { %v1161_v40 = vpop.f32.mrf.mxu1 }
 0x2da   : > { %3932 = vmatmul.mubr.f32.gmra.mxu0 %v3845_v43 }
 0x2db   : > { %v3865_v62 = vpop.f32.mrf.mxu1  ;;  %3934 = vmatprep.mubr.f32.mxu0 %v1161_v40 }
 0x2dd   : > { %v1164_v15 = vpop.f32.mrf.mxu1 }
 0x2de   : > { %3935 = vmatmul.mubr.f32.gmra.mxu0 %v1164_v15 }
 0x2df   : > { %v3868_v19 = vpop.f32.mrf.mxu1  ;;  %3937 = vmatprep.mubr.f32.mxu0 %v3864_v30 }
 0x2e1   : > { %v1177_v3 = vpop.f32.mrf.mxu1 }
 0x2e2   : > { %3938 = vmatmul.mubr.f32.gmra.mxu0 %v3865_v62 }
 0x2e3   : > { %v3869_v37 = vpop.f32.mrf.mxu1  ;;  %3940 = vmatprep.mubr.f32.mxu0 %v1177_v3 }
 0x2e5   : > { %v1180_v23 = vpop.f32.mrf.mxu1 }
 0x2e6   : > { %3941 = vmatmul.mubr.f32.gmra.mxu0 %v1180_v23 }
 0x2e7   : > { %v3872_v26 = vpop.f32.mrf.mxu1  ;;  %3943 = vmatprep.mubr.f32.mxu0 %v3868_v19 }
 0x2e9   : > { %v1193_v32 = vpop.f32.mrf.mxu1 }
 0x2ea   : > { %3944 = vmatmul.mubr.f32.gmra.mxu0 %v3869_v37 }
 0x2eb   : > { %v3873_v41 = vpop.f32.mrf.mxu1  ;;  %3946 = vmatprep.mubr.f32.mxu0 %v1193_v32 }
 0x2ed   : > { %v1196_v34 = vpop.f32.mrf.mxu1 }
 0x2ee   : > { %3947 = vmatmul.mubr.f32.gmra.mxu0 %v1196_v34 }
 0x2ef   : > { %v3876_v42 = vpop.f32.mrf.mxu1  ;;  %3949 = vmatprep.mubr.f32.mxu0 %v3872_v26  ;;  %v5212_v26 = vld [vmem:[#allocation2 + $0x1a0] ss:$0 sm:$0xff] }
 0x2f1   : > { %v1209_v38 = vpop.f32.mrf.mxu1 }
 0x2f2   : > { %3950 = vmatmul.mubr.f32.gmra.mxu0 %v3873_v41 }
 0x2f3   : > { %v3877_v27 = vpop.f32.mrf.mxu1  ;;  %3952 = vmatprep.mubr.f32.mxu0 %v1209_v38 }
 0x2f5   : > { %v1212_v31 = vpop.f32.mrf.mxu1 }
 0x2f6   : > { %3953 = vmatmul.mubr.f32.gmra.mxu0 %v1212_v31 }
 0x2f7   : > { %3955 = vmatprep.mubr.f32.mxu0 %v3876_v42  ;;  %v5172_v20 = vpop.f32.mrf.mxu1 }
 0x2f9   : > { %v5174_v24 = vpop.f32.mrf.mxu1 }
 0x2fa   : > { %3956 = vmatmul.mubr.f32.gmra.mxu0 %v3877_v27 }
 0x2fb   : > { %4054 = vmatprep.mubr.bf16.mxu0 %v4819_v52  ;;  %v5176_v11 = vpop.f32.mrf.mxu1 }
 0x2fd   : > { %v5178_v16 = vpop.f32.mrf.mxu1 }
 0x2ff   : > { %v5180_v5 = vpop.f32.mrf.mxu1 }
 0x301   : > { %v5182_v8 = vpop.f32.mrf.mxu1 }
 0x303   : > { %v5184_v9 = vpop.f32.mrf.mxu1 }
 0x305   : > { %v1545_v6 = vpop.f32.mrf.mxu1 }
 0x307   : > { %v4004_v28 = vpop.f32.mrf.mxu1 }
 0x309   : > { %v1555_v35 = vpop.f32.mrf.mxu1 }
 0x30b   : > { %v4007_v14 = vpop.f32.mrf.mxu1 }
 0x30d   : > { %v1565_v39 = vpop.f32.mrf.mxu1 }
 0x30f   : > { %v4010_v52 = vpop.f32.mrf.mxu1 }
 0x311   : > { %v1575_v45 = vpop.f32.mrf.mxu1 }
 0x313   : > { %v4013_v46 = vpop.f32.mrf.mxu1 }
 0x315   : > { %v1585_v48 = vpop.f32.mrf.mxu1 }
 0x317   : > { %v5188_v55 = vpop.f32.mrf.mxu1 }
 0x319   : > { %v5194_v61 = vpop.f32.mrf.mxu1 }
 0x31b   : > { %v5200_v51 = vpop.f32.mrf.mxu1 }
 0x31d   : > { %v5202_v4 = vpop.f32.mrf.mxu1 }
 0x31f   : > { %v5204_v53 = vpop.f32.mrf.mxu1 }
 0x321   : > { %v5206_v43 = vpop.f32.mrf.mxu1 }
 0x323   : > { %v5208_v40 = vpop.f32.mrf.mxu1 }
 0x325   : > { %v5210_v23 = vpop.f32.mrf.mxu1 }
 0x37e   : > { %v5186_v49 = vpop.f32.mrf.mxu0 }
 0x380   : > { %v5190_v57 = vpop.f32.mrf.mxu0 }
 0x382   : > { %v5192_v54 = vpop.f32.mrf.mxu0 }
 0x384   : > { %v5196_v7 = vpop.f32.mrf.mxu0 }
 0x386   : > { %v5198_v29 = vpop.f32.mrf.mxu0 }
 0x388   : > { %v1310_v2 = vpop.f32.mrf.mxu0 }
 0x38a   : > { %v3921_v58 = vpop.f32.mrf.mxu0 }
 0x38c   : > { %v1320_v63 = vpop.f32.mrf.mxu0 }
 0x38e   : > { %v3924_v60 = vpop.f32.mrf.mxu0 }
 0x390   : > { %v1330_v1 = vpop.f32.mrf.mxu0 }
 0x392   : > { %v3927_v44 = vpop.f32.mrf.mxu0 }
 0x393   : > { %v1571_v31 = vadd.f32 %v4007_v14, %v3927_v44 }
 0x394   : > { %v1340_v22 = vpop.f32.mrf.mxu0 }
 0x395   : > { %v1566_v41 = vadd.f32 %v1565_v39, %v1340_v22 }
 0x396   : > { %v3930_v30 = vpop.f32.mrf.mxu0 }
 0x397   : > { %v1581_v3 = vadd.f32 %v4010_v52, %v3930_v30  ;;  %v1556_v30 = vadd.f32 %v1555_v35, %v1330_v1  ;;  %v5233_v22 = vadd.f32 %v5212_v26, %v1566_v41 }
 0x398   : > { %v1350_v62 = vpop.f32.mrf.mxu0 }
 0x399   : > { %v1576_v15 = vadd.f32 %v1575_v45, %v1350_v62  ;;  %v5223_v45 = vadd.f32 %v5212_v26, %v1581_v3  ;;  %5911 = vst [vmem:[#allocation12_spill] sm:$0xff] %v5233_v22  ;;  %v5253_v41 = vadd.f32 %v5212_v26, %v1556_v30 }
 0x39a   : > { %v3933_v19 = vpop.f32.mrf.mxu0 }
 0x39b   : > { %v1591_v37 = vadd.f32 %v4013_v46, %v3933_v19  ;;  %v5215_v34 = vadd.f32 %v5212_v26, %v1576_v15  ;;  %5909 = vst [vmem:[#allocation10_spill] sm:$0xff] %v5223_v45  ;;  %v5228_v46 = vpop.f32.mrf.mxu1  ;;  %v1561_v15 = vadd.f32 %v4004_v28, %v3924_v60  ;;  %v5241_v19 = vadd.f32 %v5212_v26, %v1571_v31 }
 0x39c   : > { %v1360_v32 = vpop.f32.mrf.mxu0  ;;  %v5864_v3 = vmax.f32 %v5223_v45, 0.0  ;;  %5913 = vst [vmem:[#allocation14_spill] sm:$0xff] %v5253_v41  ;;  %v1551_v31 = vadd.f32 %v5184_v9, %v3921_v58 }
 0x39d   : > { %5907 = vst [vmem:[#allocation8_spill] sm:$0xff] %v5215_v34  ;;  %v5218_v42 = vadd.f32 %v5212_v26, %v1591_v37  ;;  %v1586_v38 = vadd.f32 %v1585_v48, %v1360_v32  ;;  %v5865_v62 = vmax.f32 %v5215_v34, 0.0  ;;  %5912 = vst [vmem:[#allocation13_spill] sm:$0xff] %v5241_v19  ;;  %v5248_v1 = vpop.f32.mrf.mxu1  ;;  %v1546_v32 = vadd.f32 %v1545_v6, %v1320_v63 }
 0x39e   : > { %v5220_v27 = vpop.f32.mrf.mxu0  ;;  %v5866_v6 = vmax.f32 %v5241_v19, 0.0 }
 0x39f   : > { %5908 = vst [vmem:[#allocation9_spill] sm:$0xff] %v5218_v42  ;;  %v5226_v52 = vadd.f32 %v5212_v26, %v1586_v38  ;;  %v5862_v48 = vmax.f32 %v5218_v42, 0.0  ;;  %v1781_v60 = vpack.c.bf16 %v5864_v3, %v5865_v62  ;;  %v5267_v63 = vpop.f32.mrf.mxu1  ;;  %v5273_v28 = vadd.f32 %v5212_v26, %v1546_v32 }
 0x3a0   : > { %v5230_v39 = vpop.f32.mrf.mxu0  ;;  %v5285_v62 = vadd.f32 %v5212_v26, %v1551_v31  ;;  %v1526_v3 = vadd.f32 %v5178_v16, %v5196_v7  ;;  %v1531_v31 = vadd.f32 %v5176_v11, %v5192_v54  ;;  %v1521_v54 = vadd.f32 %v5172_v20, %v5186_v49 }
 0x3a1   : > { %5910 = vst [vmem:[#allocation11_spill] sm:$0xff] %v5226_v52  ;;  %v5863_v14 = vmax.f32 %v5226_v52, 0.0 }
 0x3a2   : > { %v5238_v44 = vpop.f32.mrf.mxu0  ;;  %5916 = vst [vmem:[#allocation16_spill] sm:$0xff] %v5285_v62  ;;  %v5871_v16 = vmax.f32 %v5285_v62, 0.0  ;;  %v5309_v52 = vadd.f32 %v5212_v26, %v1526_v3  ;;  %v5331_v49 = vadd.f32 %v5212_v26, %v1521_v54 }
 0x3a3   : > { %v1782_v35 = vpack.c.bf16 %v5862_v48, %v5863_v14  ;;  %v5264_v48 = vadd.f32 %v5212_v26, %v1561_v15  ;;  %v1536_v14 = vadd.f32 %v5182_v8, %v1310_v2  ;;  %v1541_v15 = vadd.f32 %v5180_v5, %v5198_v29  ;;  %v1645_v2 = vpop.f32.mrf.mxu1 }
 0x3a4   : > { %v5250_v37 = vpop.f32.mrf.mxu0  ;;  %v5880_v45 = vmax.f32 %v5309_v52, 0.0 }
 0x3a5   : > { %4038 = vmatprep.subr.bf16.mxu0 %v1782_v35  ;;  %5914 = vst [vmem:[#allocation15_spill] sm:$0xff] %v5264_v48  ;;  %v5869_v8 = vmax.f32 %v5264_v48, 0.0  ;;  %v5303_v42 = vadd.f32 %v5212_v26, %v1541_v15  ;;  %v4034_v7 = vpop.f32.mrf.mxu1 }
 0x3a6   : > { %v5260_v38 = vpop.f32.mrf.mxu0  ;;  %4039 = vmatpush3.bf16.msra.mxu0 %v1782_v35  ;;  %v5915_v35 = vmax.f32 %v5233_v22, 0.0 }
 0x3a7   : > { %4040 = vmatprep.subr.bf16.mxu0 %v1781_v60 }
 0x3a8   : > { %v5269_v30 = vpop.f32.mrf.mxu0  ;;  %v1780_v9 = vpack.c.bf16 %v5866_v6, %v5915_v35  ;;  %v5293_v35 = vadd.f32 %v5212_v26, %v1536_v14  ;;  %v5917_v6 = vmax.f32 %v5253_v41, 0.0  ;;  %v1516_v14 = vadd.f32 %v5174_v24, %v5190_v57  ;;  %v1655_v57 = vpop.f32.mrf.mxu1 }
 0x3a9   : > { %v5875_v24 = vmax.f32 %v5303_v42, 0.0 }
 0x3aa   : > { %v5280_v58 = vpop.f32.mrf.mxu0  ;;  %4041 = vmatpush3.bf16.msra.mxu0 %v1781_v60  ;;  %v1779_v5 = vpack.c.bf16 %v5869_v8, %v5917_v6  ;;  %v5319_v8 = vadd.f32 %v5212_v26, %v1531_v31  ;;  %v5323_v3 = vadd.f32 %v5212_v26, %v1516_v14 }
 0x3ab   : > { %4042 = vmatprep.subr.bf16.mxu0 %v1780_v9 }
 0x3ac   : > { %v5288_v32 = vpop.f32.mrf.mxu0  ;;  %v5879_v31 = vmax.f32 %v5319_v8, 0.0  ;;  %v1710_v14 = vmax.f32 %v5323_v3, 0.0  ;;  %v5921_v3 = vmax.f32 %v5319_v8, 0.0  ;;  %v5929_v8 = vld [vmem:[#allocation15_spill] sm:$0xff] }
 0x3ae   : > { %v3948_v29 = vpop.f32.mrf.mxu0  ;;  %4043 = vmatpush3.bf16.msra.mxu0 %v1780_v9  ;;  %v5918_v9 = vmax.f32 %v5273_v28, 0.0  ;;  %v1776_v22 = vpack.c.bf16 %v5879_v31, %v5880_v45 }
 0x3af   : > { %4044 = vmatprep.subr.bf16.mxu0 %v1779_v5 }
 0x3b0   : > { %v1410_v60 = vpop.f32.mrf.mxu0  ;;  %v1778_v11 = vpack.c.bf16 %v5871_v16, %v5918_v9  ;;  %v5919_v9 = vmax.f32 %v5293_v35, 0.0  ;;  %v4037_v16 = vpop.f32.mrf.mxu1 }
 0x3b2   : > { %v3951_v15 = vpop.f32.mrf.mxu0  ;;  %4045 = vmatpush3.bf16.msra.mxu0 %v1779_v5  ;;  %v1777_v20 = vpack.c.bf16 %v5875_v24, %v5919_v9  ;;  %v1711_v9 = vmax.f32 %v5331_v49, 0.0  ;;  %v5923_v49 = vmax.f32 %v5303_v42, 0.0  ;;  %v5935_v42 = vld [vmem:[#allocation8_spill] sm:$0xff] }
 0x3b3   : > { %4046 = vmatprep.subr.bf16.mxu0 %v1778_v11 }
 0x3b4   : > { %v1420_v6 = vpop.f32.mrf.mxu0  ;;  %v1775_v62 = vpack.c.bf16 %v1711_v9, %v1710_v14 }
 0x3b6   : > { %v3954_v5 = vpop.f32.mrf.mxu0  ;;  %4047 = vmatpush3.bf16.msra.mxu0 %v1778_v11  ;;  %v1665_v11 = vpop.f32.mrf.mxu1 }
 0x3b7   : > { %4048 = vmatprep.subr.bf16.mxu0 %v1777_v20  ;;  %v1661_v54 = vadd.f32 %v4034_v7, %v3954_v5  ;;  %v1651_v7 = vadd.f32 %v5267_v63, %v3951_v15  ;;  %v1641_v63 = vadd.f32 %v5228_v46, %v3948_v29  ;;  %v1772_v29 = vld [vmem:[#allocation2 + $0x298] sm:$0xff] }
 0x3b8   : > { %v1430_v34 = vpop.f32.mrf.mxu0 }
 0x3b9   : > { %v1656_v19 = vadd.f32 %v1655_v57, %v1430_v34  ;;  %v1646_v34 = vadd.f32 %v1645_v2, %v1420_v6  ;;  %v5366_v6 = vadd.f32 %v5212_v26, %v1651_v7 }
 0x3ba   : > { %v3957_v24 = vpop.f32.mrf.mxu0  ;;  %4049 = vmatpush3.bf16.msra.mxu0 %v1777_v20  ;;  %v1636_v20 = vadd.f32 %v5248_v1, %v1410_v60  ;;  %v1626_v60 = vadd.f32 %v5210_v23, %v5288_v32  ;;  %v1631_v23 = vadd.f32 %v5208_v40, %v5280_v58  ;;  %v5388_v32 = vadd.f32 %v5212_v26, %v1641_v63  ;;  %v1770_v58 = vld [vmem:[#allocation2 + $0x288] sm:$0xff] }
 0x3bb   : > { %v1671_v48 = vadd.f32 %v4037_v16, %v3957_v24  ;;  %4050 = vmatprep.subr.bf16.mxu0 %v1776_v22  ;;  %v5345_v57 = vadd.f32 %v5212_v26, %v1656_v19  ;;  %v5352_v16 = vadd.f32 %v5212_v26, %v1661_v54  ;;  %v5359_v2 = vadd.f32 %v5212_v26, %v1646_v34 }
 0x3bc   : > { %v1440_v41 = vpop.f32.mrf.mxu0  ;;  %v5376_v15 = vadd.f32 %v5212_v26, %v1636_v20  ;;  %v1737_v5 = vmax.f32 %v5366_v6, 0.0  ;;  %v1616_v54 = vadd.f32 %v5206_v43, %v5269_v30  ;;  %v1621_v34 = vadd.f32 %v5204_v53, %v5260_v38  ;;  %v1769_v38 = vld [vmem:[#allocation2 + $0x280] sm:$0xff] }
 0x3bd   : > { %v5348_v31 = vadd.f32 %v5212_v26, %v1671_v48  ;;  %v1666_v45 = vadd.f32 %v1665_v11, %v1440_v41  ;;  %v1738_v19 = vmax.f32 %v5345_v57, 0.0  ;;  %v1773_v41 = vld [vmem:[#allocation2 + $0x2a0] sm:$0xff]  ;;  %v5394_v11 = vadd.f32 %v5212_v26, %v1626_v60 }
 0x3be   : > { %4051 = vmatpush3.bf16.msra.mxu0 %v1776_v22  ;;  %v5404_v7 = vadd.f32 %v5212_v26, %v1631_v23  ;;  %v1735_v43 = vmax.f32 %v5388_v32, 0.0  ;;  %v1606_v30 = vadd.f32 %v5202_v4, %v5250_v37  ;;  %v5410_v20 = vadd.f32 %v5212_v26, %v1616_v54 }
 0x3bf   : > { %v5355_v24 = vadd.f32 %v5212_v26, %v1666_v45  ;;  %4052 = vmatprep.subr.bf16.mxu0 %v1775_v62  ;;  %v1741_v48 = vmax.f32 %v5348_v31, 0.0  ;;  %v1739_v45 = vmax.f32 %v5352_v16, 0.0  ;;  %v1611_v63 = vadd.f32 %v5200_v51, %v5238_v44  ;;  %v1767_v44 = vld [vmem:[#allocation2 + $0x270] sm:$0xff]  ;;  %v2516_v16 = vld [vmem:[#allocation2 + $0x318] sm:$0xff] }
 0x3c0   : > { %v5422_v4 = vadd.f32 %v5212_v26, %v1621_v34  ;;  %v1733_v37 = vmax.f32 %v5404_v7, 0.0  ;;  %v5428_v60 = vadd.f32 %v5212_v26, %v1606_v30  ;;  %v1764_v34 = vld [vmem:[#allocation2 + $0x258] sm:$0xff] }
 0x3c1   : > { %v1740_v22 = vmax.f32 %v5355_v24, 0.0  ;;  %v1789_v46 = vpack.c.bf16 %v1739_v45, %v1738_v19  ;;  %v2515_v24 = vld [vmem:[#allocation2 + $0x310] sm:$0xff] }
 0x3c2   : > { %4053 = vmatpush3.bf16.msra.mxu0 %v1775_v62  ;;  %v1736_v62 = vmax.f32 %v5359_v2, 0.0  ;;  %v1728_v23 = vmax.f32 %v5428_v60, 0.0 }
 0x3c3   : > { %v1790_v1 = vpack.c.bf16 %v1741_v48, %v1740_v22  ;;  %4102 = vmatprep.subr.mxu0 %v1773_v41 }
 0x3c4   : > { %v1788_v40 = vpack.c.bf16 %v1737_v5, %v1736_v62 }
 0x3c5   : > { %4055 = vmatmul.mubr.bf16.vlgmr.msra.gmra.mxu0 %v4965_v36  ;;  %4070 = vmatprep.subr.bf16.mxu1 %v1790_v1  ;;  %v1771_v36 = vld [vmem:[#allocation2 + $0x290] sm:$0xff] }
 0x3c6   : > { %4071 = vmatpush3.bf16.msra.mxu1 %v1790_v1  ;;  %4058 = vmatprep.mubr.bf16.mxu0 %v4968_v50  ;;  %v1734_v50 = vmax.f32 %v5376_v15, 0.0  ;;  %v1596_v1 = vadd.f32 %v5194_v61, %v5230_v39  ;;  %v1731_v61 = vmax.f32 %v5422_v4, 0.0  ;;  %v2518_v15 = vld [vmem:[#allocation2 + $0x328] sm:$0xff] }
 0x3c7   : > { %4072 = vmatprep.subr.bf16.mxu1 %v1789_v46  ;;  %4103 = vmatpush3.msra.mxu0 %v1773_v41  ;;  %v1732_v41 = vmax.f32 %v5394_v11, 0.0 }
 0x3c8   : > { %4104 = vmatprep.subr.mxu0 %v1772_v29  ;;  %v1787_v53 = vpack.c.bf16 %v1735_v43, %v1734_v50  ;;  %v5442_v39 = vadd.f32 %v5212_v26, %v1596_v1  ;;  %v1754_v1 = vld [vmem:[#allocation2 + $0x208] sm:$0xff] }
 0x3c9   : > { %4105 = vmatpush3.msra.mxu0 %v1772_v29  ;;  %v1786_v51 = vpack.c.bf16 %v1733_v37, %v1732_v41  ;;  %v5438_v29 = vadd.f32 %v5212_v26, %v1611_v63  ;;  %v1761_v63 = vld [vmem:[#allocation2 + $0x240] sm:$0xff] }
 0x3ca   : > { %4073 = vmatpush3.bf16.msra.mxu1 %v1789_v46  ;;  %4106 = vmatprep.subr.mxu0 %v1771_v36  ;;  %v1601_v46 = vadd.f32 %v5188_v55, %v5220_v27  ;;  %v1766_v27 = vld [vmem:[#allocation2 + $0x268] sm:$0xff] }
 0x3cb   : > { %4074 = vmatprep.subr.bf16.mxu1 %v1788_v40  ;;  %4107 = vmatpush3.msra.mxu0 %v1771_v36  ;;  %v1729_v54 = vmax.f32 %v5438_v29, 0.0 }
 0x3cc   : > { %4108 = vmatprep.subr.mxu0 %v1770_v58  ;;  %v5452_v36 = vadd.f32 %v5212_v26, %v1601_v46  ;;  %v1763_v26 = vld [vmem:[#allocation2 + $0x250] sm:$0xff] }
 0x3cd   : > { %4059 = vmatmul.mubr.bf16.gmra.mxu0 %v5002_v18  ;;  %v1768_v18 = vld [vmem:[#allocation2 + $0x278] sm:$0xff]  ;;  %v1751_v46 = vld [vmem:[#allocation2 + $0x1f0] sm:$0xff] }
 0x3ce   : > { %4075 = vmatpush3.bf16.msra.mxu1 %v1788_v40  ;;  %4062 = vmatprep.mubr.bf16.mxu0 %v5005_v13  ;;  %v1730_v13 = vmax.f32 %v5410_v20, 0.0  ;;  %v1765_v40 = vld [vmem:[#allocation2 + $0x260] sm:$0xff] }
 0x3cf   : > { %4076 = vmatprep.subr.bf16.mxu1 %v1787_v53  ;;  %4109 = vmatpush3.msra.mxu0 %v1770_v58  ;;  %v1784_v58 = vpack.c.bf16 %v1729_v54, %v1728_v23 }
 0x3d0   : > { %4110 = vmatprep.subr.mxu0 %v1769_v38  ;;  %v1785_v55 = vpack.c.bf16 %v1731_v61, %v1730_v13 }
 0x3d1   : > { %4111 = vmatpush3.msra.mxu0 %v1769_v38  ;;  %v1757_v38 = vld [vmem:[#allocation2 + $0x220] sm:$0xff] }
 0x3d2   : > { %4077 = vmatpush3.bf16.msra.mxu1 %v1787_v53  ;;  %4112 = vmatprep.subr.mxu0 %v1768_v18  ;;  %v1762_v53 = vld [vmem:[#allocation2 + $0x248] sm:$0xff] }
 0x3d3   : > { %4078 = vmatprep.subr.bf16.mxu1 %v1786_v51  ;;  %4113 = vmatpush3.msra.mxu0 %v1768_v18  ;;  %v1756_v18 = vld [vmem:[#allocation2 + $0x218] sm:$0xff] }
 0x3d4   : > { %4114 = vmatprep.subr.mxu0 %v1767_v44 }
 0x3d5   : > { %4063 = vmatmul.mubr.bf16.gmra.mxu0 %v5038_v59  ;;  %v1726_v59 = vmax.f32 %v5442_v39, 0.0 }
 0x3d6   : > { %4079 = vmatpush3.bf16.msra.mxu1 %v1786_v51  ;;  %4066 = vmatprep.mubr.bf16.mxu0 %v5041_v17  ;;  %v1727_v17 = vmax.f32 %v5452_v36, 0.0  ;;  %v1753_v51 = vld [vmem:[#allocation2 + $0x200] sm:$0xff] }
 0x3d7   : > { %4080 = vmatprep.subr.bf16.mxu1 %v1785_v55  ;;  %4115 = vmatpush3.msra.mxu0 %v1767_v44  ;;  %v1752_v44 = vld [vmem:[#allocation2 + $0x1f8] sm:$0xff] }
 0x3d8   : > { %4116 = vmatprep.subr.mxu0 %v1766_v27  ;;  %v1783_v30 = vpack.c.bf16 %v1727_v17, %v1726_v59 }
 0x3d9   : > { %4117 = vmatpush3.msra.mxu0 %v1766_v27  ;;  %v1747_v27 = vld [vmem:[#allocation2 + $0x1d0] sm:$0xff] }
 0x3da   : > { %4081 = vmatpush3.bf16.msra.mxu1 %v1785_v55  ;;  %4118 = vmatprep.subr.mxu0 %v1765_v40  ;;  %v1748_v55 = vld [vmem:[#allocation2 + $0x1d8] sm:$0xff] }
 0x3db   : > { %4082 = vmatprep.subr.bf16.mxu1 %v1784_v58  ;;  %4119 = vmatpush3.msra.mxu0 %v1765_v40  ;;  %v1744_v40 = vld [vmem:[#allocation2 + $0x1b8] sm:$0xff] }
 0x3dc   : > { %4120 = vmatprep.subr.mxu0 %v1764_v34 }
 0x3dd   : > { %4067 = vmatmul.mubr.bf16.gmra.mxu0 %v5070_v56  ;;  %v1755_v56 = vld [vmem:[#allocation2 + $0x210] sm:$0xff] }
 0x3de   : > { %4083 = vmatpush3.bf16.msra.mxu1 %v1784_v58  ;;  %4121 = vmatpush3.msra.mxu0 %v1764_v34  ;;  %v1760_v58 = vld [vmem:[#allocation2 + $0x238] sm:$0xff]  ;;  %v5920_v34 = vmax.f32 %v5309_v52, 0.0  ;;  %v5924_v52 = vmax.f32 %v5273_v28, 0.0  ;;  %v5937_v28 = vld [vmem:[#allocation10_spill] sm:$0xff] }
 0x3df   : > { %4084 = vmatprep.subr.bf16.mxu1 %v1783_v30  ;;  %4122 = vmatprep.subr.mxu0 %v1763_v26 }
 0x3e0   : > { %4123 = vmatpush3.msra.mxu0 %v1763_v26  ;;  %v5922_v26 = vmax.f32 %v5293_v35, 0.0 }
 0x3e1   : > { %4124 = vmatprep.subr.mxu0 %v1762_v53 }
 0x3e2   : > { %4085 = vmatpush3.bf16.msra.mxu1 %v1783_v30  ;;  %4125 = vmatpush3.msra.mxu0 %v1762_v53  ;;  %v5927_v53 = vld [vmem:[#allocation14_spill] sm:$0xff] }
 0x3e3   : > { %4182 = vmatprep.subr.mxu1 %v1757_v38  ;;  %4126 = vmatprep.subr.mxu0 %v1761_v63 }
 0x3e4   : > { %4127 = vmatpush3.msra.mxu0 %v1761_v63  ;;  %v5930_v63 = vmax.f32 %v5929_v8, 0.0  ;;  %v5537_v8 = vld [vmem:[#allocation2 + $0x3b0] sm:$0xff] }
 0x3e5   : > { %4087 = vmatmul.mubr.bf16.vlgmr.msra.gmra.mxu1 %v5079_v47  ;;  %v1750_v47 = vld [vmem:[#allocation2 + $0x1e8] sm:$0xff]  ;;  %4128 = vmatprep.subr.mxu0 %v1760_v58 }
 0x3e6   : > { %4183 = vmatpush3.msra.mxu1 %v1757_v38  ;;  %4090 = vmatprep.mubr.bf16.mxu1 %v5082_v0  ;;  %v1749_v0 = vld [vmem:[#allocation2 + $0x1e0] sm:$0xff]  ;;  %v5928_v38 = vmax.f32 %v5927_v53, 0.0 }
 0x3e7   : > { %4184 = vmatprep.subr.mxu1 %v1756_v18  ;;  %4129 = vmatpush3.msra.mxu0 %v1760_v58 }
 0x3e8   : > { %4185 = vmatpush3.msra.mxu1 %v1756_v18  ;;  %v5931_v18 = vld [vmem:[#allocation12_spill] sm:$0xff] }
 0x3e9   : > { %4186 = vmatprep.subr.mxu1 %v1755_v56  ;;  %v5932_v35 = vmax.f32 %v5931_v18, 0.0 }
 0x3ea   : > { %4187 = vmatpush3.msra.mxu1 %v1755_v56  ;;  %v5933_v56 = vld [vmem:[#allocation13_spill] sm:$0xff] }
 0x3eb   : > { %4188 = vmatprep.subr.mxu1 %v1754_v1 }
 0x3ec   : > { %4189 = vmatpush3.msra.mxu1 %v1754_v1  ;;  %v5934_v1 = vmax.f32 %v5933_v56, 0.0  ;;  %v5549_v56 = vld [vmem:[#allocation2 + $0x398] sm:$0xff] }
 0x3ed   : > { %4091 = vmatmul.mubr.bf16.gmra.mxu1 %v5087_v10  ;;  %4190 = vmatprep.subr.mxu1 %v1753_v51  ;;  %v1746_v10 = vld [vmem:[#allocation2 + $0x1c8] sm:$0xff] }
 0x3ee   : > { %4191 = vmatpush3.msra.mxu1 %v1753_v51  ;;  %4094 = vmatprep.mubr.bf16.mxu1 %v5090_v33  ;;  %v1745_v33 = vld [vmem:[#allocation2 + $0x1c0] sm:$0xff]  ;;  %v5936_v51 = vmax.f32 %v5935_v42, 0.0  ;;  %v5553_v42 = vld [vmem:[#allocation2 + $0x390] sm:$0xff] }
 0x3ef   : > { %4192 = vmatprep.subr.mxu1 %v1752_v44 }
 0x3f0   : > { %4193 = vmatpush3.msra.mxu1 %v1752_v44  ;;  %v5938_v44 = vmax.f32 %v5937_v28, 0.0 }
 0x3f1   : > { %4194 = vmatprep.subr.mxu1 %v1751_v46 }
 0x3f2   : > { %4195 = vmatpush3.msra.mxu1 %v1751_v46  ;;  %v5939_v46 = vld [vmem:[#allocation11_spill] sm:$0xff] }
 0x3f3   : > { %4196 = vmatprep.subr.mxu1 %v1750_v47 }
 0x3f4   : > { %4197 = vmatpush3.msra.mxu1 %v1750_v47  ;;  %v5940_v47 = vmax.f32 %v5939_v46, 0.0  ;;  %v5565_v46 = vld [vmem:[#allocation2 + $0x378] sm:$0xff] }
 0x3f5   : > { %4095 = vmatmul.mubr.bf16.gmra.mxu1 %v5095_v12  ;;  %4198 = vmatprep.subr.mxu1 %v1749_v0  ;;  %v1743_v12 = vld [vmem:[#allocation2 + $0x1b0] sm:$0xff] }
 0x3f6   : > { %4199 = vmatpush3.msra.mxu1 %v1749_v0  ;;  %4098 = vmatprep.mubr.bf16.mxu1 %v5098_v25  ;;  %v1742_v25 = vld [vmem:[#allocation2 + $0x1a8] sm:$0xff] }
 0x3f7   : > { %4200 = vmatprep.subr.mxu1 %v1748_v55  ;;  %v5941_v0 = vld [vmem:[#allocation9_spill] sm:$0xff] }
 0x3f8   : > { %4201 = vmatpush3.msra.mxu1 %v1748_v55  ;;  %v5942_v55 = vmax.f32 %v5941_v0, 0.0  ;;  %v5569_v0 = vld [vmem:[#allocation2 + $0x370] sm:$0xff] }
 0x3f9   : > { %4202 = vmatprep.subr.mxu1 %v1747_v27 }
 0x3fa   : > { %4203 = vmatpush3.msra.mxu1 %v1747_v27 }
 0x3fb   : > { %4204 = vmatprep.subr.mxu1 %v1746_v10 }
 0x3fc   : > { %4205 = vmatpush3.msra.mxu1 %v1746_v10 }
 0x3fd   : > { %4099 = vmatmul.mubr.bf16.gmra.mxu1 %v5103_v21  ;;  %4206 = vmatprep.subr.mxu1 %v1745_v33  ;;  %v1759_v21 = vld [vmem:[#allocation2 + $0x230] sm:$0xff] }
 0x3fe   : > { %4207 = vmatpush3.msra.mxu1 %v1745_v33  ;;  %4214 = vmatprep.mubr.f32.mxu1 %v1710_v14  ;;  %v1758_v14 = vld [vmem:[#allocation2 + $0x228] sm:$0xff] }
 0x3ff   : > { %4208 = vmatprep.subr.mxu1 %v1744_v40  ;;  %4130 = vmatprep.subr.mxu0 %v1759_v21 }
 0x400   : > { %4209 = vmatpush3.msra.mxu1 %v1744_v40  ;;  %4131 = vmatpush3.msra.mxu0 %v1759_v21 }
 0x401   : > { %4210 = vmatprep.subr.mxu1 %v1743_v12  ;;  %4132 = vmatprep.subr.mxu0 %v1758_v14 }
 0x402   : > { %4211 = vmatpush3.msra.mxu1 %v1743_v12  ;;  %4133 = vmatpush3.msra.mxu0 %v1758_v14 }
 0x403   : > { %4212 = vmatprep.subr.mxu1 %v1742_v25  ;;  %4262 = vmatprep.subr.mxu0 %v2518_v15 }
 0x404   : > { %4213 = vmatpush3.msra.mxu1 %v1742_v25 }
 0x405   : > { %4215 = vmatmul.mubr.f32.vlgmr.msra.gmra.mxu1 %v1711_v9  ;;  %v5925_v9 = vld [vmem:[#allocation16_spill] sm:$0xff]  ;;  %4422 = vmatprep.subr.mxu1 %v5537_v8 }
 0x406   : > { %4217 = vmatprep.mubr.f32.mxu1 %v5920_v34  ;;  %v5926_v30 = vmax.f32 %v5925_v9, 0.0  ;;  %v2504_v9 = vld [vmem:[#allocation2 + $0x2b8] sm:$0xff]  ;;  %4438 = vmatpush3.msra.mxu1 %v5537_v8 }
 0x409   : > { %4218 = vmatmul.mubr.f32.gmra.mxu1 %v5921_v3 }
 0x40a   : > { %4220 = vmatprep.mubr.f32.mxu1 %v5922_v26  ;;  %v2507_v26 = vld [vmem:[#allocation2 + $0x2d0] sm:$0xff] }
 0x40d   : > { %4221 = vmatmul.mubr.f32.gmra.mxu1 %v5923_v49  ;;  %v2506_v49 = vld [vmem:[#allocation2 + $0x2c8] sm:$0xff] }
 0x40e   : > { %4223 = vmatprep.mubr.f32.mxu1 %v5924_v52  ;;  %v2505_v52 = vld [vmem:[#allocation2 + $0x2c0] sm:$0xff] }
 0x411   : > { %4224 = vmatmul.mubr.f32.gmra.mxu1 %v5926_v30  ;;  %v2503_v30 = vld [vmem:[#allocation2 + $0x2b0] sm:$0xff] }
 0x412   : > { %4226 = vmatprep.mubr.f32.mxu1 %v5928_v38 }
 0x415   : > { %4227 = vmatmul.mubr.f32.gmra.mxu1 %v5930_v63  ;;  %v5541_v63 = vld [vmem:[#allocation2 + $0x3a8] sm:$0xff] }
 0x416   : > { %4229 = vmatprep.mubr.f32.mxu1 %v5932_v35  ;;  %4423 = vmatprep.subr.mxu1 %v5541_v63  ;;  %v5545_v35 = vld [vmem:[#allocation2 + $0x3a0] sm:$0xff] }
 0x417   : > { %4439 = vmatpush3.msra.mxu1 %v5541_v63 }
 0x418   : > { %4424 = vmatprep.subr.mxu1 %v5545_v35 }
 0x419   : > { %4230 = vmatmul.mubr.f32.gmra.mxu1 %v5934_v1 }
 0x41a   : > { %4232 = vmatprep.mubr.f32.mxu1 %v5936_v51  ;;  %4440 = vmatpush3.msra.mxu1 %v5545_v35  ;;  %v5557_v51 = vld [vmem:[#allocation2 + $0x388] sm:$0xff] }
 0x41b   : > { %4425 = vmatprep.subr.mxu1 %v5549_v56 }
 0x41c   : > { %4441 = vmatpush3.msra.mxu1 %v5549_v56 }
 0x41d   : > { %4233 = vmatmul.mubr.f32.gmra.mxu1 %v5938_v44  ;;  %4426 = vmatprep.subr.mxu1 %v5553_v42  ;;  %v5561_v44 = vld [vmem:[#allocation2 + $0x380] sm:$0xff] }
 0x41e   : > { %4235 = vmatprep.mubr.f32.mxu1 %v5940_v47  ;;  %4442 = vmatpush3.msra.mxu1 %v5553_v42 }
 0x41f   : > { %4427 = vmatprep.subr.mxu1 %v5557_v51 }
 0x420   : > { %4443 = vmatpush3.msra.mxu1 %v5557_v51 }
 0x421   : > { %4236 = vmatmul.mubr.f32.gmra.mxu1 %v5942_v55  ;;  %4428 = vmatprep.subr.mxu1 %v5561_v44  ;;  %v5573_v55 = vld [vmem:[#allocation2 + $0x368] sm:$0xff] }
 0x422   : > { %4238 = vmatprep.mubr.f32.mxu1 %v1726_v59  ;;  %4444 = vmatpush3.msra.mxu1 %v5561_v44 }
 0x423   : > { %4429 = vmatprep.subr.mxu1 %v5565_v46 }
 0x424   : > { %4445 = vmatpush3.msra.mxu1 %v5565_v46 }
 0x425   : > { %4239 = vmatmul.mubr.f32.gmra.mxu1 %v1727_v17  ;;  %4430 = vmatprep.subr.mxu1 %v5569_v0 }
 0x426   : > { %4241 = vmatprep.mubr.f32.mxu1 %v1728_v23  ;;  %4446 = vmatpush3.msra.mxu1 %v5569_v0 }
 0x427   : > { %4431 = vmatprep.subr.mxu1 %v5573_v55 }
 0x428   : > { %4447 = vmatpush3.msra.mxu1 %v5573_v55 }
 0x429   : > { %4242 = vmatmul.mubr.f32.gmra.mxu1 %v1729_v54 }
 0x42a   : > { %4244 = vmatprep.mubr.f32.mxu1 %v1730_v13  ;;  %v2508_v13 = vld [vmem:[#allocation2 + $0x2d8] sm:$0xff] }
 0x42d   : > { %4245 = vmatmul.mubr.f32.gmra.mxu1 %v1731_v61 }
 0x42e   : > { %4247 = vmatprep.mubr.f32.mxu1 %v1732_v41  ;;  %v2510_v41 = vld [vmem:[#allocation2 + $0x2e8] sm:$0xff] }
 0x431   : > { %4248 = vmatmul.mubr.f32.gmra.mxu1 %v1733_v37  ;;  %v2509_v37 = vld [vmem:[#allocation2 + $0x2e0] sm:$0xff] }
 0x432   : > { %4250 = vmatprep.mubr.f32.mxu1 %v1734_v50  ;;  %v2512_v50 = vld [vmem:[#allocation2 + $0x2f8] sm:$0xff] }
 0x435   : > { %4251 = vmatmul.mubr.f32.gmra.mxu1 %v1735_v43  ;;  %v2511_v43 = vld [vmem:[#allocation2 + $0x2f0] sm:$0xff] }
 0x436   : > { %4253 = vmatprep.mubr.f32.mxu1 %v1736_v62 }
 0x439   : > { %4254 = vmatmul.mubr.f32.gmra.mxu1 %v1737_v5  ;;  %v2517_v5 = vld [vmem:[#allocation2 + $0x320] sm:$0xff] }
 0x43a   : > { %4256 = vmatprep.mubr.f32.mxu1 %v1738_v19 }
 0x43d   : > { %4257 = vmatmul.mubr.f32.gmra.mxu1 %v1739_v45  ;;  %v2513_v45 = vld [vmem:[#allocation2 + $0x300] sm:$0xff] }
 0x43e   : > { %4259 = vmatprep.mubr.f32.mxu1 %v1740_v22 }
 0x441   : > { %4260 = vmatmul.mubr.f32.gmra.mxu1 %v1741_v48  ;;  %v2514_v48 = vld [vmem:[#allocation2 + $0x308] sm:$0xff] }
 0x485   : > { %v4056_v32 = vpop.f32.mrf.mxu0 }
 0x487   : > { %v1825_v2 = vpop.f32.mrf.mxu0 }
 0x488   : > { %4134 = vmatprep.mubr.f32.mxu0 %v1825_v2  ;;  %v5581_v2 = vld [vmem:[#allocation2 + $0x358] sm:$0xff] }
 0x489   : > { %v4057_v62 = vpop.f32.mrf.mxu0 }
 0x48b   : > { %v1828_v6 = vpop.f32.mrf.mxu0 }
 0x48c   : > { %4135 = vmatmul.mubr.f32.vlgmr.msra.gmra.mxu0 %v1828_v6 }
 0x48d   : > { %v4060_v57 = vpop.f32.mrf.mxu0  ;;  %4137 = vmatprep.mubr.f32.mxu0 %v4056_v32  ;;  %4263 = vmatpush3.msra.mxu0 %v2518_v15  ;;  %v5577_v32 = vld [vmem:[#allocation2 + $0x360] sm:$0xff] }
 0x48e   : > { %4264 = vmatprep.subr.mxu0 %v2517_v5  ;;  %4432 = vmatprep.subr.mxu1 %v5577_v32 }
 0x48f   : > { %v1841_v19 = vpop.f32.mrf.mxu0  ;;  %4265 = vmatpush3.msra.mxu0 %v2517_v5  ;;  %4448 = vmatpush3.msra.mxu1 %v5577_v32 }
 0x490   : > { %4138 = vmatmul.mubr.f32.gmra.mxu0 %v4057_v62  ;;  %4266 = vmatprep.subr.mxu0 %v2516_v16 }
 0x491   : > { %v4061_v31 = vpop.f32.mrf.mxu0  ;;  %4140 = vmatprep.mubr.f32.mxu0 %v1841_v19  ;;  %4267 = vmatpush3.msra.mxu0 %v2516_v16 }
 0x492   : > { %4268 = vmatprep.subr.mxu0 %v2515_v24  ;;  %4433 = vmatprep.subr.mxu1 %v5581_v2 }
 0x493   : > { %v1844_v22 = vpop.f32.mrf.mxu0  ;;  %4269 = vmatpush3.msra.mxu0 %v2515_v24  ;;  %4449 = vmatpush3.msra.mxu1 %v5581_v2 }
 0x494   : > { %4141 = vmatmul.mubr.f32.gmra.mxu0 %v1844_v22  ;;  %4270 = vmatprep.subr.mxu0 %v2514_v48 }
 0x495   : > { %v4064_v11 = vpop.f32.mrf.mxu0  ;;  %4143 = vmatprep.mubr.f32.mxu0 %v4060_v57  ;;  %4271 = vmatpush3.msra.mxu0 %v2514_v48 }
 0x496   : > { %4272 = vmatprep.subr.mxu0 %v2513_v45 }
 0x497   : > { %v1857_v7 = vpop.f32.mrf.mxu0  ;;  %4273 = vmatpush3.msra.mxu0 %v2513_v45  ;;  %v5598_v45 = vld [vmem:[#allocation2 + $0x2a8] ss:$0 sm:$0xff] }
 0x498   : > { %4144 = vmatmul.mubr.f32.gmra.mxu0 %v4061_v31  ;;  %4274 = vmatprep.subr.mxu0 %v2512_v50 }
 0x499   : > { %v4065_v20 = vpop.f32.mrf.mxu0  ;;  %4146 = vmatprep.mubr.f32.mxu0 %v1857_v7  ;;  %4275 = vmatpush3.msra.mxu0 %v2512_v50 }
 0x49a   : > { %4276 = vmatprep.subr.mxu0 %v2511_v43 }
 0x49b   : > { %v1860_v4 = vpop.f32.mrf.mxu0  ;;  %4277 = vmatpush3.msra.mxu0 %v2511_v43 }
 0x49c   : > { %4147 = vmatmul.mubr.f32.gmra.mxu0 %v1860_v4  ;;  %4278 = vmatprep.subr.mxu0 %v2510_v41 }
 0x49d   : > { %v4068_v60 = vpop.f32.mrf.mxu0  ;;  %4149 = vmatprep.mubr.f32.mxu0 %v4064_v11  ;;  %4279 = vmatpush3.msra.mxu0 %v2510_v41 }
 0x49e   : > { %4280 = vmatprep.subr.mxu0 %v2509_v37 }
 0x49f   : > { %v1873_v29 = vpop.f32.mrf.mxu0  ;;  %4281 = vmatpush3.msra.mxu0 %v2509_v37 }
 0x4a0   : > { %4150 = vmatmul.mubr.f32.gmra.mxu0 %v4065_v20  ;;  %4282 = vmatprep.subr.mxu0 %v2508_v13 }
 0x4a1   : > { %v4069_v61 = vpop.f32.mrf.mxu0  ;;  %4152 = vmatprep.mubr.f32.mxu0 %v1873_v29  ;;  %4283 = vmatpush3.msra.mxu0 %v2508_v13 }
 0x4a2   : > { %4284 = vmatprep.subr.mxu0 %v2507_v26 }
 0x4a3   : > { %v1876_v39 = vpop.f32.mrf.mxu0  ;;  %4285 = vmatpush3.msra.mxu0 %v2507_v26 }
 0x4a4   : > { %4153 = vmatmul.mubr.f32.gmra.mxu0 %v1876_v39  ;;  %4286 = vmatprep.subr.mxu0 %v2506_v49 }
 0x4a5   : > { %v4088_v23 = vpop.f32.mrf.mxu1  ;;  %4155 = vmatprep.mubr.f32.mxu0 %v4068_v60  ;;  %4287 = vmatpush3.msra.mxu0 %v2506_v49 }
 0x4a6   : > { %4288 = vmatprep.subr.mxu0 %v2505_v52 }
 0x4a7   : > { %v1922_v36 = vpop.f32.mrf.mxu1  ;;  %4289 = vmatpush3.msra.mxu0 %v2505_v52 }
 0x4a8   : > { %4156 = vmatmul.mubr.f32.gmra.mxu0 %v4069_v61  ;;  %4290 = vmatprep.subr.mxu0 %v2504_v9 }
 0x4a9   : > { %v4089_v54 = vpop.f32.mrf.mxu1  ;;  %4158 = vmatprep.mubr.f32.mxu0 %v1922_v36  ;;  %4291 = vmatpush3.msra.mxu0 %v2504_v9 }
 0x4aa   : > { %4292 = vmatprep.subr.mxu0 %v2503_v30 }
 0x4ab   : > { %v1925_v59 = vpop.f32.mrf.mxu1  ;;  %4293 = vmatpush3.msra.mxu0 %v2503_v30 }
 0x4ac   : > { %4159 = vmatmul.mubr.f32.gmra.mxu0 %v1925_v59  ;;  %4342 = vmatprep.subr.mxu0 %v5537_v8 }
 0x4ad   : > { %v4092_v17 = vpop.f32.mrf.mxu1  ;;  %4161 = vmatprep.mubr.f32.mxu0 %v4088_v23 }
 0x4af   : > { %v1938_v27 = vpop.f32.mrf.mxu1 }
 0x4b0   : > { %4162 = vmatmul.mubr.f32.gmra.mxu0 %v4089_v54 }
 0x4b1   : > { %v4093_v10 = vpop.f32.mrf.mxu1  ;;  %4164 = vmatprep.mubr.f32.mxu0 %v1938_v27 }
 0x4b3   : > { %v1941_v33 = vpop.f32.mrf.mxu1 }
 0x4b4   : > { %4165 = vmatmul.mubr.f32.gmra.mxu0 %v1941_v33 }
 0x4b5   : > { %v4096_v40 = vpop.f32.mrf.mxu1  ;;  %4167 = vmatprep.mubr.f32.mxu0 %v4092_v17 }
 0x4b7   : > { %v1954_v12 = vpop.f32.mrf.mxu1 }
 0x4b8   : > { %4168 = vmatmul.mubr.f32.gmra.mxu0 %v4093_v10 }
 0x4b9   : > { %v4097_v25 = vpop.f32.mrf.mxu1  ;;  %4170 = vmatprep.mubr.f32.mxu0 %v1954_v12 }
 0x4bb   : > { %v1957_v58 = vpop.f32.mrf.mxu1 }
 0x4bc   : > { %4171 = vmatmul.mubr.f32.gmra.mxu0 %v1957_v58 }
 0x4bd   : > { %v4100_v34 = vpop.f32.mrf.mxu1  ;;  %4173 = vmatprep.mubr.f32.mxu0 %v4096_v40 }
 0x4bf   : > { %v1970_v21 = vpop.f32.mrf.mxu1 }
 0x4c0   : > { %4174 = vmatmul.mubr.f32.gmra.mxu0 %v4097_v25 }
 0x4c1   : > { %v4101_v3 = vpop.f32.mrf.mxu1  ;;  %4176 = vmatprep.mubr.f32.mxu0 %v1970_v21 }
 0x4c3   : > { %v1973_v14 = vpop.f32.mrf.mxu1 }
 0x4c4   : > { %4177 = vmatmul.mubr.f32.gmra.mxu0 %v1973_v14 }
 0x4c5   : > { %4179 = vmatprep.mubr.f32.mxu0 %v4100_v34  ;;  %v4216_v53 = vpop.f32.mrf.mxu1 }
 0x4c7   : > { %v2276_v38 = vpop.f32.mrf.mxu1 }
 0x4c8   : > { %4180 = vmatmul.mubr.f32.gmra.mxu0 %v4101_v3 }
 0x4c9   : > { %v4219_v18 = vpop.f32.mrf.mxu1 }
 0x4cb   : > { %v2286_v1 = vpop.f32.mrf.mxu1 }
 0x4cd   : > { %v4222_v28 = vpop.f32.mrf.mxu1 }
 0x4cf   : > { %v2296_v47 = vpop.f32.mrf.mxu1 }
 0x4d1   : > { %v4225_v15 = vpop.f32.mrf.mxu1 }
 0x4d3   : > { %v2306_v62 = vpop.f32.mrf.mxu1 }
 0x4d5   : > { %v4228_v6 = vpop.f32.mrf.mxu1 }
 0x4d7   : > { %v2316_v5 = vpop.f32.mrf.mxu1 }
 0x4d9   : > { %v5586_v57 = vpop.f32.mrf.mxu1 }
 0x4db   : > { %v5588_v16 = vpop.f32.mrf.mxu1 }
 0x4dd   : > { %v5590_v19 = vpop.f32.mrf.mxu1 }
 0x4df   : > { %v5592_v24 = vpop.f32.mrf.mxu1 }
 0x4e1   : > { %v5594_v31 = vpop.f32.mrf.mxu1 }
 0x4e3   : > { %v5596_v48 = vpop.f32.mrf.mxu1 }
 0x4e5   : > { %v5600_v50 = vpop.f32.mrf.mxu1 }
 0x4e7   : > { %v5604_v60 = vpop.f32.mrf.mxu1 }
 0x4e9   : > { %v5608_v17 = vpop.f32.mrf.mxu1 }
 0x4eb   : > { %v5615_v21 = vpop.f32.mrf.mxu1 }
 0x54c   : > { %v4136_v22 = vpop.f32.mrf.mxu0 }
 0x54d   : > { %v2282_v11 = vadd.f32 %v4216_v53, %v4136_v22 }
 0x54e   : > { %v2051_v7 = vpop.f32.mrf.mxu0 }
 0x54f   : > { %v2277_v43 = vadd.f32 %v2276_v38, %v2051_v7  ;;  %v2440_v20 = vadd.f32 %v5598_v45, %v2282_v11  ;;  %v5623_v38 = vpop.f32.mrf.mxu1 }
 0x550   : > { %v4139_v41 = vpop.f32.mrf.mxu0 }
 0x551   : > { %v2439_v4 = vadd.f32 %v5598_v45, %v2277_v43  ;;  %v2292_v37 = vadd.f32 %v4219_v18, %v4139_v41  ;;  %v2472_v39 = vmax.f32 %v2440_v20, 0.0 }
 0x552   : > { %v2061_v13 = vpop.f32.mrf.mxu0 }
 0x553   : > { %v2471_v29 = vmax.f32 %v2439_v4, 0.0  ;;  %v2287_v61 = vadd.f32 %v2286_v1, %v2061_v13  ;;  %v2442_v23 = vadd.f32 %v5598_v45, %v2292_v37 }
 0x554   : > { %v4142_v36 = vpop.f32.mrf.mxu0 }
 0x555   : > { %v2441_v54 = vadd.f32 %v5598_v45, %v2287_v61  ;;  %v2302_v59 = vadd.f32 %v4222_v28, %v4142_v36  ;;  %4294 = vmatprep.mubr.f32.mxu0 %v2471_v29  ;;  %v2474_v40 = vmax.f32 %v2442_v23, 0.0 }
 0x556   : > { %v2071_v27 = vpop.f32.mrf.mxu0  ;;  %4295 = vmatmul.mubr.f32.vlgmr.msra.gmra.mxu0 %v2472_v39 }
 0x557   : > { %v2473_v10 = vmax.f32 %v2441_v54, 0.0  ;;  %v2297_v33 = vadd.f32 %v2296_v47, %v2071_v27  ;;  %4343 = vmatpush3.msra.mxu0 %v5537_v8  ;;  %v2444_v12 = vadd.f32 %v5598_v45, %v2302_v59 }
 0x558   : > { %v4145_v25 = vpop.f32.mrf.mxu0  ;;  %4344 = vmatprep.subr.mxu0 %v5541_v63 }
 0x559   : > { %v2443_v58 = vadd.f32 %v5598_v45, %v2297_v33  ;;  %v2312_v34 = vadd.f32 %v4225_v15, %v4145_v25  ;;  %4297 = vmatprep.mubr.f32.mxu0 %v2473_v10  ;;  %4345 = vmatpush3.msra.mxu0 %v5541_v63  ;;  %v2476_v49 = vmax.f32 %v2444_v12, 0.0  ;;  %v5632_v15 = vpop.f32.mrf.mxu1 }
 0x55a   : > { %v2081_v3 = vpop.f32.mrf.mxu0  ;;  %4298 = vmatmul.mubr.f32.gmra.mxu0 %v2474_v40  ;;  %4346 = vmatprep.subr.mxu0 %v5545_v35 }
 0x55b   : > { %v2475_v14 = vmax.f32 %v2443_v58, 0.0  ;;  %v2307_v26 = vadd.f32 %v2306_v62, %v2081_v3  ;;  %4347 = vmatpush3.msra.mxu0 %v5545_v35  ;;  %v2446_v52 = vadd.f32 %v5598_v45, %v2312_v34  ;;  %v4249_v7 = vpop.f32.mrf.mxu1 }
 0x55c   : > { %v4148_v9 = vpop.f32.mrf.mxu0  ;;  %4348 = vmatprep.subr.mxu0 %v5549_v56 }
 0x55d   : > { %v2445_v30 = vadd.f32 %v5598_v45, %v2307_v26  ;;  %v2322_v53 = vadd.f32 %v4228_v6, %v4148_v9  ;;  %4300 = vmatprep.mubr.f32.mxu0 %v2475_v14  ;;  %4349 = vmatpush3.msra.mxu0 %v5549_v56  ;;  %v2478_v35 = vmax.f32 %v2446_v52, 0.0  ;;  %v2386_v37 = vpop.f32.mrf.mxu1 }
 0x55e   : > { %v2091_v8 = vpop.f32.mrf.mxu0  ;;  %4301 = vmatmul.mubr.f32.gmra.mxu0 %v2476_v49  ;;  %4350 = vmatprep.subr.mxu0 %v5553_v42 }
 0x55f   : > { %v2477_v63 = vmax.f32 %v2445_v30, 0.0  ;;  %v2317_v18 = vadd.f32 %v2316_v5, %v2091_v8  ;;  %4351 = vmatpush3.msra.mxu0 %v5553_v42  ;;  %v2448_v1 = vadd.f32 %v5598_v45, %v2322_v53  ;;  %v4252_v23 = vpop.f32.mrf.mxu1 }
 0x560   : > { %v4151_v28 = vpop.f32.mrf.mxu0  ;;  %4352 = vmatprep.subr.mxu0 %v5557_v51 }
 0x561   : > { %v2447_v47 = vadd.f32 %v5598_v45, %v2317_v18  ;;  %v2332_v56 = vadd.f32 %v5586_v57, %v4151_v28  ;;  %4303 = vmatprep.mubr.f32.mxu0 %v2477_v63  ;;  %4353 = vmatpush3.msra.mxu0 %v5557_v51  ;;  %v2480_v5 = vmax.f32 %v2448_v1, 0.0  ;;  %v2396_v40 = vpop.f32.mrf.mxu1 }
 0x562   : > { %v2101_v62 = vpop.f32.mrf.mxu0  ;;  %4304 = vmatmul.mubr.f32.gmra.mxu0 %v2478_v35  ;;  %4354 = vmatprep.subr.mxu0 %v5561_v44 }
 0x563   : > { %v2479_v42 = vmax.f32 %v2447_v47, 0.0  ;;  %v2327_v6 = vadd.f32 %v5588_v16, %v2101_v62  ;;  %4355 = vmatpush3.msra.mxu0 %v5561_v44  ;;  %v2450_v22 = vadd.f32 %v5598_v45, %v2332_v56  ;;  %v4255_v14 = vpop.f32.mrf.mxu1 }
 0x564   : > { %v4154_v11 = vpop.f32.mrf.mxu0  ;;  %4356 = vmatprep.subr.mxu0 %v5565_v46 }
 0x565   : > { %v2449_v57 = vadd.f32 %v5598_v45, %v2327_v6  ;;  %v2342_v51 = vadd.f32 %v5590_v19, %v4154_v11  ;;  %4306 = vmatprep.mubr.f32.mxu0 %v2479_v42  ;;  %4357 = vmatpush3.msra.mxu0 %v5565_v46  ;;  %v2482_v20 = vmax.f32 %v2450_v22, 0.0  ;;  %v2406_v8 = vpop.f32.mrf.mxu1 }
 0x566   : > { %v2111_v43 = vpop.f32.mrf.mxu0  ;;  %4307 = vmatmul.mubr.f32.gmra.mxu0 %v2480_v5  ;;  %4358 = vmatprep.subr.mxu0 %v5569_v0 }
 0x567   : > { %v2481_v16 = vmax.f32 %v2449_v57, 0.0  ;;  %v2337_v44 = vadd.f32 %v5592_v24, %v2111_v43  ;;  %4359 = vmatpush3.msra.mxu0 %v5569_v0  ;;  %v2452_v41 = vadd.f32 %v5598_v45, %v2342_v51 }
 0x568   : > { %v4157_v4 = vpop.f32.mrf.mxu0  ;;  %4360 = vmatprep.subr.mxu0 %v5573_v55 }
 0x569   : > { %v2451_v19 = vadd.f32 %v5598_v45, %v2337_v44  ;;  %v2352_v46 = vadd.f32 %v5594_v31, %v4157_v4  ;;  %4309 = vmatprep.mubr.f32.mxu0 %v2481_v16  ;;  %4361 = vmatpush3.msra.mxu0 %v5573_v55  ;;  %v2484_v29 = vmax.f32 %v2452_v41, 0.0 }
 0x56a   : > { %v2121_v13 = vpop.f32.mrf.mxu0  ;;  %4310 = vmatmul.mubr.f32.gmra.mxu0 %v2482_v20  ;;  %4362 = vmatprep.subr.mxu0 %v5577_v32 }
 0x56b   : > { %v2483_v24 = vmax.f32 %v2451_v19, 0.0  ;;  %v2347_v0 = vadd.f32 %v5596_v48, %v2121_v13  ;;  %4363 = vmatpush3.msra.mxu0 %v5577_v32  ;;  %v2454_v61 = vadd.f32 %v5598_v45, %v2352_v46 }
 0x56c   : > { %v4160_v39 = vpop.f32.mrf.mxu0  ;;  %4364 = vmatprep.subr.mxu0 %v5581_v2 }
 0x56d   : > { %v2453_v31 = vadd.f32 %v5598_v45, %v2347_v0  ;;  %v2362_v55 = vadd.f32 %v5600_v50, %v4160_v39  ;;  %4312 = vmatprep.mubr.f32.mxu0 %v2483_v24  ;;  %4365 = vmatpush3.msra.mxu0 %v5581_v2  ;;  %v2486_v32 = vmax.f32 %v2454_v61, 0.0 }
 0x56e   : > { %v2131_v36 = vpop.f32.mrf.mxu0  ;;  %4313 = vmatmul.mubr.f32.gmra.mxu0 %v2484_v29 }
 0x56f   : > { %v2485_v54 = vmax.f32 %v2453_v31, 0.0  ;;  %v2357_v48 = vadd.f32 %v5604_v60, %v2131_v36  ;;  %v2456_v59 = vadd.f32 %v5598_v45, %v2362_v55 }
 0x570   : > { %v4163_v27 = vpop.f32.mrf.mxu0 }
 0x571   : > { %v2455_v10 = vadd.f32 %v5598_v45, %v2357_v48  ;;  %v2372_v33 = vadd.f32 %v5608_v17, %v4163_v27  ;;  %4315 = vmatprep.mubr.f32.mxu0 %v2485_v54  ;;  %v2488_v25 = vmax.f32 %v2456_v59, 0.0 }
 0x572   : > { %v2141_v50 = vpop.f32.mrf.mxu0  ;;  %4316 = vmatmul.mubr.f32.gmra.mxu0 %v2486_v32 }
 0x573   : > { %v2487_v12 = vmax.f32 %v2455_v10, 0.0  ;;  %v2367_v2 = vadd.f32 %v5615_v21, %v2141_v50  ;;  %v2458_v58 = vadd.f32 %v5598_v45, %v2372_v33  ;;  %v2783_v50 = vld [vmem:[#allocation2 + $0x348] sm:$0xff] }
 0x574   : > { %v4166_v34 = vpop.f32.mrf.mxu0 }
 0x575   : > { %v2457_v60 = vadd.f32 %v5598_v45, %v2367_v2  ;;  %v2382_v3 = vadd.f32 %v5623_v38, %v4166_v34  ;;  %4318 = vmatprep.mubr.f32.mxu0 %v2487_v12  ;;  %v2490_v52 = vmax.f32 %v2458_v58, 0.0  ;;  %v2782_v12 = vld [vmem:[#allocation2 + $0x340] sm:$0xff]  ;;  %v5679_v2 = vld [vmem:[#allocation2 + $0x330] ss:$0 sm:$0xff] }
 0x576   : > { %v2151_v26 = vpop.f32.mrf.mxu0  ;;  %4319 = vmatmul.mubr.f32.gmra.mxu0 %v2488_v25 }
 0x577   : > { %v2489_v17 = vmax.f32 %v2457_v60, 0.0  ;;  %v2377_v49 = vadd.f32 %v5632_v15, %v2151_v26  ;;  %v2460_v9 = vadd.f32 %v5598_v45, %v2382_v3  ;;  %v4258_v15 = vpop.f32.mrf.mxu1 }
 0x578   : > { %v4169_v30 = vpop.f32.mrf.mxu0 }
 0x579   : > { %v2459_v21 = vadd.f32 %v5598_v45, %v2377_v49  ;;  %v2392_v53 = vadd.f32 %v4249_v7, %v4169_v30  ;;  %4321 = vmatprep.mubr.f32.mxu0 %v2489_v17  ;;  %v2492_v35 = vmax.f32 %v2460_v9, 0.0  ;;  %v2416_v7 = vpop.f32.mrf.mxu1 }
 0x57a   : > { %v2161_v63 = vpop.f32.mrf.mxu0  ;;  %4322 = vmatmul.mubr.f32.gmra.mxu0 %v2490_v52 }
 0x57b   : > { %v2491_v18 = vmax.f32 %v2459_v21, 0.0  ;;  %v2387_v38 = vadd.f32 %v2386_v37, %v2161_v63  ;;  %v2462_v1 = vadd.f32 %v5598_v45, %v2392_v53  ;;  %v4261_v37 = vpop.f32.mrf.mxu1 }
 0x57c   : > { %v4172_v28 = vpop.f32.mrf.mxu0 }
 0x57d   : > { %v2461_v47 = vadd.f32 %v5598_v45, %v2387_v38  ;;  %v2402_v56 = vadd.f32 %v4252_v23, %v4172_v28  ;;  %4324 = vmatprep.mubr.f32.mxu0 %v2491_v18  ;;  %v2494_v5 = vmax.f32 %v2462_v1, 0.0  ;;  %v2426_v23 = vpop.f32.mrf.mxu1 }
 0x57e   : > { %v2171_v62 = vpop.f32.mrf.mxu0  ;;  %4325 = vmatmul.mubr.f32.gmra.mxu0 %v2492_v35 }
 0x57f   : > { %v2493_v42 = vmax.f32 %v2461_v47, 0.0  ;;  %v2397_v6 = vadd.f32 %v2396_v40, %v2171_v62  ;;  %v2464_v22 = vadd.f32 %v5598_v45, %v2402_v56  ;;  %v2784_v40 = vld [vmem:[#allocation2 + $0x350] sm:$0xff] }
 0x580   : > { %v4175_v11 = vpop.f32.mrf.mxu0  ;;  %4366 = vmatprep.subr.mxu0 %v2784_v40  ;;  %4434 = vmatprep.subr.mxu1 %v2784_v40 }
 0x581   : > { %v2463_v57 = vadd.f32 %v5598_v45, %v2397_v6  ;;  %v2412_v51 = vadd.f32 %v4255_v14, %v4175_v11  ;;  %4327 = vmatprep.mubr.f32.mxu0 %v2493_v42  ;;  %v2496_v20 = vmax.f32 %v2464_v22, 0.0  ;;  %4367 = vmatpush3.msra.mxu0 %v2784_v40 }
 0x582   : > { %v2181_v43 = vpop.f32.mrf.mxu0  ;;  %4328 = vmatmul.mubr.f32.gmra.mxu0 %v2494_v5  ;;  %4450 = vmatpush3.msra.mxu1 %v2784_v40 }
 0x583   : > { %v2495_v16 = vmax.f32 %v2463_v57, 0.0  ;;  %v2407_v44 = vadd.f32 %v2406_v8, %v2181_v43  ;;  %v2466_v41 = vadd.f32 %v5598_v45, %v2412_v51  ;;  %4368 = vmatprep.subr.mxu0 %v2783_v50  ;;  %4435 = vmatprep.subr.mxu1 %v2783_v50 }
 0x584   : > { %v4178_v4 = vpop.f32.mrf.mxu0  ;;  %4369 = vmatpush3.msra.mxu0 %v2783_v50  ;;  %4451 = vmatpush3.msra.mxu1 %v2783_v50 }
 0x585   : > { %v2465_v19 = vadd.f32 %v5598_v45, %v2407_v44  ;;  %v2422_v46 = vadd.f32 %v4258_v15, %v4178_v4  ;;  %4330 = vmatprep.mubr.f32.mxu0 %v2495_v16  ;;  %v2498_v29 = vmax.f32 %v2466_v41, 0.0  ;;  %4370 = vmatprep.subr.mxu0 %v2782_v12 }
 0x586   : > { %v2191_v13 = vpop.f32.mrf.mxu0  ;;  %4331 = vmatmul.mubr.f32.gmra.mxu0 %v2496_v20  ;;  %4436 = vmatprep.subr.mxu1 %v2782_v12 }
 0x587   : > { %v2497_v24 = vmax.f32 %v2465_v19, 0.0  ;;  %v2417_v0 = vadd.f32 %v2416_v7, %v2191_v13  ;;  %v2468_v61 = vadd.f32 %v5598_v45, %v2422_v46  ;;  %4371 = vmatpush3.msra.mxu0 %v2782_v12  ;;  %4452 = vmatpush3.msra.mxu1 %v2782_v12 }
 0x588   : > { %v4181_v39 = vpop.f32.mrf.mxu0 }
 0x589   : > { %v2467_v31 = vadd.f32 %v5598_v45, %v2417_v0  ;;  %v2432_v55 = vadd.f32 %v4261_v37, %v4181_v39  ;;  %4333 = vmatprep.mubr.f32.mxu0 %v2497_v24  ;;  %v2500_v32 = vmax.f32 %v2468_v61, 0.0 }
 0x58a   : > { %v2201_v36 = vpop.f32.mrf.mxu0  ;;  %4334 = vmatmul.mubr.f32.gmra.mxu0 %v2498_v29 }
 0x58b   : > { %v2499_v54 = vmax.f32 %v2467_v31, 0.0  ;;  %v2427_v48 = vadd.f32 %v2426_v23, %v2201_v36  ;;  %v2470_v59 = vadd.f32 %v5598_v45, %v2432_v55 }
 0x58d   : > { %v2469_v27 = vadd.f32 %v5598_v45, %v2427_v48  ;;  %4336 = vmatprep.mubr.f32.mxu0 %v2499_v54  ;;  %v2502_v33 = vmax.f32 %v2470_v59, 0.0  ;;  %v2781_v45 = vld [vmem:[#allocation2 + $0x338] sm:$0xff] }
 0x58e   : > { %4337 = vmatmul.mubr.f32.gmra.mxu0 %v2500_v32  ;;  %4372 = vmatprep.subr.mxu0 %v2781_v45 }
 0x58f   : > { %v2501_v10 = vmax.f32 %v2469_v27, 0.0  ;;  %4437 = vmatprep.subr.mxu1 %v2781_v45  ;;  %4373 = vmatpush3.msra.mxu0 %v2781_v45 }
 0x590   : > { %4453 = vmatpush3.msra.mxu1 %v2781_v45 }
 0x591   : > { %4339 = vmatprep.mubr.f32.mxu0 %v2501_v10 }
 0x592   : > { %4340 = vmatmul.mubr.f32.gmra.mxu0 %v2502_v33 }
 0x616   : > { %v4296_v25 = vpop.f32.mrf.mxu0 }
 0x617   : > { %v2596_v58 = vadd.f32 %v4296_v25, %v5679_v2 }
 0x618   : > { %v2590_v34 = vpop.f32.mrf.mxu0 }
 0x619   : > { %v2591_v60 = vadd.f32 %v5679_v2, %v2590_v34  ;;  %v2750_v26 = vmax.f32 %v2596_v58, 0.0 }
 0x61a   : > { %v4299_v3 = vpop.f32.mrf.mxu0 }
 0x61b   : > { %v2749_v14 = vmax.f32 %v2591_v60, 0.0  ;;  %v2606_v17 = vadd.f32 %v4299_v3, %v5679_v2 }
 0x61c   : > { %v2600_v49 = vpop.f32.mrf.mxu0 }
 0x61d   : > { %v2601_v52 = vadd.f32 %v5679_v2, %v2600_v49  ;;  %4374 = vmatprep.mubr.f32.mxu0 %v2749_v14  ;;  %v2752_v21 = vmax.f32 %v2606_v17, 0.0 }
 0x61e   : > { %v4302_v9 = vpop.f32.mrf.mxu0  ;;  %4375 = vmatmul.mubr.f32.vlgmr.msra.gmra.mxu0 %v2750_v26 }
 0x61f   : > { %v2751_v30 = vmax.f32 %v2601_v52, 0.0  ;;  %v2616_v53 = vadd.f32 %v4302_v9, %v5679_v2 }
 0x620   : > { %v2610_v8 = vpop.f32.mrf.mxu0 }
 0x621   : > { %v2611_v63 = vadd.f32 %v5679_v2, %v2610_v8  ;;  %4377 = vmatprep.mubr.f32.mxu0 %v2751_v30  ;;  %v2754_v35 = vmax.f32 %v2616_v53, 0.0 }
 0x622   : > { %v4305_v18 = vpop.f32.mrf.mxu0  ;;  %4378 = vmatmul.mubr.f32.gmra.mxu0 %v2752_v21 }
 0x623   : > { %v2753_v38 = vmax.f32 %v2611_v63, 0.0  ;;  %v2626_v1 = vadd.f32 %v4305_v18, %v5679_v2 }
 0x624   : > { %v2620_v28 = vpop.f32.mrf.mxu0 }
 0x625   : > { %v2621_v47 = vadd.f32 %v5679_v2, %v2620_v28  ;;  %4380 = vmatprep.mubr.f32.mxu0 %v2753_v38  ;;  %v2756_v62 = vmax.f32 %v2626_v1, 0.0 }
 0x626   : > { %v4308_v56 = vpop.f32.mrf.mxu0  ;;  %4381 = vmatmul.mubr.f32.gmra.mxu0 %v2754_v35 }
 0x627   : > { %v2755_v15 = vmax.f32 %v2621_v47, 0.0  ;;  %v2636_v42 = vadd.f32 %v4308_v56, %v5679_v2 }
 0x628   : > { %v2630_v6 = vpop.f32.mrf.mxu0 }
 0x629   : > { %v2631_v5 = vadd.f32 %v5679_v2, %v2630_v6  ;;  %4383 = vmatprep.mubr.f32.mxu1 %v2755_v15  ;;  %v2758_v57 = vmax.f32 %v2636_v42, 0.0 }
 0x62a   : > { %v4311_v22 = vpop.f32.mrf.mxu0  ;;  %4384 = vmatmul.mubr.f32.vlgmr.msra.gmra.mxu1 %v2756_v62 }
 0x62b   : > { %v2757_v11 = vmax.f32 %v2631_v5, 0.0  ;;  %v2646_v51 = vadd.f32 %v4311_v22, %v5679_v2 }
 0x62c   : > { %v2640_v7 = vpop.f32.mrf.mxu0 }
 0x62d   : > { %v2641_v43 = vadd.f32 %v5679_v2, %v2640_v7  ;;  %4386 = vmatprep.mubr.f32.mxu1 %v2757_v11  ;;  %v2760_v20 = vmax.f32 %v2646_v51, 0.0 }
 0x62e   : > { %v4314_v16 = vpop.f32.mrf.mxu0  ;;  %4387 = vmatmul.mubr.f32.gmra.mxu1 %v2758_v57 }
 0x62f   : > { %v2759_v44 = vmax.f32 %v2641_v43, 0.0  ;;  %v2656_v41 = vadd.f32 %v4314_v16, %v5679_v2  ;;  %v5716_v43 = vld [vmem:[#allocation2 + $0x3b8] ss:$0 sm:$0xff] }
 0x630   : > { %v2650_v4 = vpop.f32.mrf.mxu0 }
 0x631   : > { %v2651_v19 = vadd.f32 %v5679_v2, %v2650_v4  ;;  %4389 = vmatprep.mubr.f32.mxu1 %v2759_v44  ;;  %v2762_v13 = vmax.f32 %v2656_v41, 0.0 }
 0x632   : > { %v4317_v46 = vpop.f32.mrf.mxu0  ;;  %4390 = vmatmul.mubr.f32.gmra.mxu1 %v2760_v20 }
 0x633   : > { %v2761_v37 = vmax.f32 %v2651_v19, 0.0  ;;  %v2666_v24 = vadd.f32 %v4317_v46, %v5679_v2 }
 0x634   : > { %v2660_v0 = vpop.f32.mrf.mxu0 }
 0x635   : > { %v2661_v29 = vadd.f32 %v5679_v2, %v2660_v0  ;;  %4392 = vmatprep.mubr.f32.mxu1 %v2761_v37  ;;  %v2764_v31 = vmax.f32 %v2666_v24, 0.0 }
 0x636   : > { %v4320_v61 = vpop.f32.mrf.mxu0  ;;  %4393 = vmatmul.mubr.f32.gmra.mxu1 %v2762_v13 }
 0x637   : > { %v2763_v39 = vmax.f32 %v2661_v29, 0.0  ;;  %v2676_v55 = vadd.f32 %v4320_v61, %v5679_v2 }
 0x638   : > { %v2670_v23 = vpop.f32.mrf.mxu0 }
 0x639   : > { %v2671_v36 = vadd.f32 %v5679_v2, %v2670_v23  ;;  %4395 = vmatprep.mubr.f32.mxu1 %v2763_v39  ;;  %v2766_v32 = vmax.f32 %v2676_v55, 0.0 }
 0x63a   : > { %v4323_v54 = vpop.f32.mrf.mxu0  ;;  %4396 = vmatmul.mubr.f32.gmra.mxu1 %v2764_v31 }
 0x63b   : > { %v2765_v48 = vmax.f32 %v2671_v36, 0.0  ;;  %v2686_v59 = vadd.f32 %v4323_v54, %v5679_v2 }
 0x63c   : > { %v2680_v27 = vpop.f32.mrf.mxu0 }
 0x63d   : > { %v2681_v10 = vadd.f32 %v5679_v2, %v2680_v27  ;;  %4398 = vmatprep.mubr.f32.mxu1 %v2765_v48  ;;  %v2768_v50 = vmax.f32 %v2686_v59, 0.0 }
 0x63e   : > { %v4326_v33 = vpop.f32.mrf.mxu0  ;;  %4399 = vmatmul.mubr.f32.gmra.mxu1 %v2766_v32 }
 0x63f   : > { %v2767_v40 = vmax.f32 %v2681_v10, 0.0  ;;  %v2696_v12 = vadd.f32 %v4326_v33, %v5679_v2 }
 0x640   : > { %v2690_v45 = vpop.f32.mrf.mxu0 }
 0x641   : > { %v2691_v25 = vadd.f32 %v5679_v2, %v2690_v45  ;;  %4401 = vmatprep.mubr.f32.mxu1 %v2767_v40  ;;  %v2770_v60 = vmax.f32 %v2696_v12, 0.0 }
 0x642   : > { %v4329_v58 = vpop.f32.mrf.mxu0  ;;  %4402 = vmatmul.mubr.f32.gmra.mxu1 %v2768_v50 }
 0x643   : > { %v2769_v34 = vmax.f32 %v2691_v25, 0.0  ;;  %v2706_v3 = vadd.f32 %v4329_v58, %v5679_v2 }
 0x644   : > { %v2700_v14 = vpop.f32.mrf.mxu0 }
 0x645   : > { %v2701_v26 = vadd.f32 %v5679_v2, %v2700_v14  ;;  %4404 = vmatprep.mubr.f32.mxu1 %v2769_v34  ;;  %v2772_v52 = vmax.f32 %v2706_v3, 0.0 }
 0x646   : > { %v4332_v17 = vpop.f32.mrf.mxu0  ;;  %4405 = vmatmul.mubr.f32.gmra.mxu1 %v2770_v60 }
 0x647   : > { %v2771_v49 = vmax.f32 %v2701_v26, 0.0  ;;  %v2716_v9 = vadd.f32 %v4332_v17, %v5679_v2 }
 0x648   : > { %v2710_v30 = vpop.f32.mrf.mxu0 }
 0x649   : > { %v2711_v21 = vadd.f32 %v5679_v2, %v2710_v30  ;;  %4407 = vmatprep.mubr.f32.mxu1 %v2771_v49  ;;  %v2774_v63 = vmax.f32 %v2716_v9, 0.0 }
 0x64a   : > { %v4335_v53 = vpop.f32.mrf.mxu0  ;;  %4408 = vmatmul.mubr.f32.gmra.mxu1 %v2772_v52 }
 0x64b   : > { %v2773_v8 = vmax.f32 %v2711_v21, 0.0  ;;  %v2726_v18 = vadd.f32 %v4335_v53, %v5679_v2 }
 0x64c   : > { %v2720_v38 = vpop.f32.mrf.mxu0 }
 0x64d   : > { %v2721_v35 = vadd.f32 %v5679_v2, %v2720_v38  ;;  %4410 = vmatprep.mubr.f32.mxu1 %v2773_v8  ;;  %v2776_v47 = vmax.f32 %v2726_v18, 0.0 }
 0x64e   : > { %v4338_v1 = vpop.f32.mrf.mxu0  ;;  %4411 = vmatmul.mubr.f32.gmra.mxu1 %v2774_v63 }
 0x64f   : > { %v2775_v28 = vmax.f32 %v2721_v35, 0.0  ;;  %v2736_v56 = vadd.f32 %v4338_v1, %v5679_v2 }
 0x650   : > { %v2730_v15 = vpop.f32.mrf.mxu0 }
 0x651   : > { %v2731_v62 = vadd.f32 %v5679_v2, %v2730_v15  ;;  %4413 = vmatprep.mubr.f32.mxu1 %v2775_v28  ;;  %v2778_v5 = vmax.f32 %v2736_v56, 0.0 }
 0x652   : > { %v4341_v42 = vpop.f32.mrf.mxu0  ;;  %4414 = vmatmul.mubr.f32.gmra.mxu1 %v2776_v47 }
 0x653   : > { %v2777_v6 = vmax.f32 %v2731_v62, 0.0  ;;  %v2746_v22 = vadd.f32 %v4341_v42, %v5679_v2 }
 0x654   : > { %v2740_v11 = vpop.f32.mrf.mxu0 }
 0x655   : > { %v2741_v57 = vadd.f32 %v5679_v2, %v2740_v11  ;;  %4416 = vmatprep.mubr.f32.mxu1 %v2777_v6  ;;  %v2780_v7 = vmax.f32 %v2746_v22, 0.0 }
 0x656   : > { %4417 = vmatmul.mubr.f32.gmra.mxu1 %v2778_v5 }
 0x657   : > { %v2779_v51 = vmax.f32 %v2741_v57, 0.0 }
 0x659   : > { %4419 = vmatprep.mubr.f32.mxu1 %v2779_v51 }
 0x65a   : > { %4420 = vmatmul.mubr.f32.gmra.mxu1 %v2780_v7 }
 0x6de   : > { %v4376_v16 = vpop.f32.mrf.mxu0 }
 0x6df   : > { %v2874_v44 = vadd.f32 %v4376_v16, %v5716_v43 }
 0x6e0   : > { %v2868_v20 = vpop.f32.mrf.mxu0 }
 0x6e1   : > { %3028 = vst [vmem:[%s5719_s26 + $0x8] sm:$0xff] %v2874_v44  ;;  %v2869_v2 = vadd.f32 %v5716_v43, %v2868_v20 }
 0x6e2   : > { %v4379_v41 = vpop.f32.mrf.mxu0 }
 0x6e3   : > { %3027 = vst [vmem:[%s5719_s26] sm:$0xff] %v2869_v2  ;;  %v2884_v4 = vadd.f32 %v4379_v41, %v5716_v43 }
 0x6e4   : > { %v2878_v19 = vpop.f32.mrf.mxu0 }
 0x6e5   : > { %3030 = vst [vmem:[%s5719_s26 + $0x18] sm:$0xff] %v2884_v4  ;;  %v2879_v46 = vadd.f32 %v5716_v43, %v2878_v19 }
 0x6e6   : > { %v4382_v37 = vpop.f32.mrf.mxu0 }
 0x6e7   : > { %3029 = vst [vmem:[%s5719_s26 + $0x10] sm:$0xff] %v2879_v46  ;;  %v2894_v13 = vadd.f32 %v4382_v37, %v5716_v43 }
 0x6e8   : > { %v2888_v24 = vpop.f32.mrf.mxu0 }
 0x6e9   : > { %3032 = vst [vmem:[%s5719_s26 + $0x28] sm:$0xff] %v2894_v13  ;;  %v2889_v0 = vadd.f32 %v5716_v43, %v2888_v24 }
 0x6ea   : > { %v4385_v29 = vpop.f32.mrf.mxu1 }
 0x6eb   : > { %3031 = vst [vmem:[%s5719_s26 + $0x20] sm:$0xff] %v2889_v0  ;;  %v2904_v61 = vadd.f32 %v4385_v29, %v5716_v43 }
 0x6ec   : > { %v2898_v39 = vpop.f32.mrf.mxu1 }
 0x6ed   : > { %3034 = vst [vmem:[%s5719_s26 + $0x38] sm:$0xff] %v2904_v61  ;;  %v2899_v31 = vadd.f32 %v5716_v43, %v2898_v39 }
 0x6ee   : > { %v4388_v55 = vpop.f32.mrf.mxu1 }
 0x6ef   : > { %3033 = vst [vmem:[%s5719_s26 + $0x30] sm:$0xff] %v2899_v31  ;;  %v2914_v23 = vadd.f32 %v4388_v55, %v5716_v43 }
 0x6f0   : > { %v2908_v36 = vpop.f32.mrf.mxu1 }
 0x6f1   : > { %3036 = vst [vmem:[%s5719_s26 + $0x48] sm:$0xff] %v2914_v23  ;;  %v2909_v54 = vadd.f32 %v5716_v43, %v2908_v36 }
 0x6f2   : > { %v4391_v48 = vpop.f32.mrf.mxu1 }
 0x6f3   : > { %3035 = vst [vmem:[%s5719_s26 + $0x40] sm:$0xff] %v2909_v54  ;;  %v2924_v32 = vadd.f32 %v4391_v48, %v5716_v43 }
 0x6f4   : > { %v2918_v59 = vpop.f32.mrf.mxu1 }
 0x6f5   : > { %3038 = vst [vmem:[%s5719_s26 + $0x58] sm:$0xff] %v2924_v32  ;;  %v2919_v27 = vadd.f32 %v5716_v43, %v2918_v59 }
 0x6f6   : > { %v4394_v10 = vpop.f32.mrf.mxu1 }
 0x6f7   : > { %3037 = vst [vmem:[%s5719_s26 + $0x50] sm:$0xff] %v2919_v27  ;;  %v2934_v33 = vadd.f32 %v4394_v10, %v5716_v43 }
 0x6f8   : > { %v2928_v40 = vpop.f32.mrf.mxu1 }
 0x6f9   : > { %3040 = vst [vmem:[%s5719_s26 + $0x68] sm:$0xff] %v2934_v33  ;;  %v2929_v50 = vadd.f32 %v5716_v43, %v2928_v40 }
 0x6fa   : > { %v4397_v12 = vpop.f32.mrf.mxu1 }
 0x6fb   : > { %3039 = vst [vmem:[%s5719_s26 + $0x60] sm:$0xff] %v2929_v50  ;;  %v2944_v45 = vadd.f32 %v4397_v12, %v5716_v43 }
 0x6fc   : > { %v2938_v25 = vpop.f32.mrf.mxu1 }
 0x6fd   : > { %3042 = vst [vmem:[%s5719_s26 + $0x78] sm:$0xff] %v2944_v45  ;;  %v2939_v58 = vadd.f32 %v5716_v43, %v2938_v25 }
 0x6fe   : > { %v4400_v34 = vpop.f32.mrf.mxu1 }
 0x6ff   : > { %3041 = vst [vmem:[%s5719_s26 + $0x70] sm:$0xff] %v2939_v58  ;;  %v2954_v60 = vadd.f32 %v4400_v34, %v5716_v43 }
 0x700   : > { %v2948_v3 = vpop.f32.mrf.mxu1 }
 0x701   : > { %3044 = vst [vmem:[%s5719_s26 + $0x88] sm:$0xff] %v2954_v60  ;;  %v2949_v14 = vadd.f32 %v5716_v43, %v2948_v3 }
 0x702   : > { %v4403_v26 = vpop.f32.mrf.mxu1 }
 0x703   : > { %3043 = vst [vmem:[%s5719_s26 + $0x80] sm:$0xff] %v2949_v14  ;;  %v2964_v17 = vadd.f32 %v4403_v26, %v5716_v43 }
 0x704   : > { %v2958_v49 = vpop.f32.mrf.mxu1 }
 0x705   : > { %3046 = vst [vmem:[%s5719_s26 + $0x98] sm:$0xff] %v2964_v17  ;;  %v2959_v52 = vadd.f32 %v5716_v43, %v2958_v49 }
 0x706   : > { %v4406_v9 = vpop.f32.mrf.mxu1 }
 0x707   : > { %3045 = vst [vmem:[%s5719_s26 + $0x90] sm:$0xff] %v2959_v52  ;;  %v2974_v30 = vadd.f32 %v4406_v9, %v5716_v43 }
 0x708   : > { %v2968_v21 = vpop.f32.mrf.mxu1 }
 0x709   : > { %3048 = vst [vmem:[%s5719_s26 + $0xa8] sm:$0xff] %v2974_v30  ;;  %v2969_v53 = vadd.f32 %v5716_v43, %v2968_v21 }
 0x70a   : > { %v4409_v8 = vpop.f32.mrf.mxu1 }
 0x70b   : > { %3047 = vst [vmem:[%s5719_s26 + $0xa0] sm:$0xff] %v2969_v53  ;;  %v2984_v63 = vadd.f32 %v4409_v8, %v5716_v43 }
 0x70c   : > { %v2978_v18 = vpop.f32.mrf.mxu1 }
 0x70d   : > { %3050 = vst [vmem:[%s5719_s26 + $0xb8] sm:$0xff] %v2984_v63  ;;  %v2979_v38 = vadd.f32 %v5716_v43, %v2978_v18 }
 0x70e   : > { %v4412_v35 = vpop.f32.mrf.mxu1 }
 0x70f   : > { %3049 = vst [vmem:[%s5719_s26 + $0xb0] sm:$0xff] %v2979_v38  ;;  %v2994_v1 = vadd.f32 %v4412_v35, %v5716_v43 }
 0x710   : > { %v2988_v28 = vpop.f32.mrf.mxu1 }
 0x711   : > { %3052 = vst [vmem:[%s5719_s26 + $0xc8] sm:$0xff] %v2994_v1  ;;  %v2989_v47 = vadd.f32 %v5716_v43, %v2988_v28 }
 0x712   : > { %v4415_v56 = vpop.f32.mrf.mxu1 }
 0x713   : > { %3051 = vst [vmem:[%s5719_s26 + $0xc0] sm:$0xff] %v2989_v47  ;;  %v3004_v15 = vadd.f32 %v4415_v56, %v5716_v43 }
 0x714   : > { %v2998_v62 = vpop.f32.mrf.mxu1 }
 0x715   : > { %3054 = vst [vmem:[%s5719_s26 + $0xd8] sm:$0xff] %v3004_v15  ;;  %v2999_v42 = vadd.f32 %v5716_v43, %v2998_v62 }
 0x716   : > { %v4418_v6 = vpop.f32.mrf.mxu1 }
 0x717   : > { %3053 = vst [vmem:[%s5719_s26 + $0xd0] sm:$0xff] %v2999_v42  ;;  %v3014_v5 = vadd.f32 %v4418_v6, %v5716_v43 }
 0x718   : > { %v3008_v22 = vpop.f32.mrf.mxu1 }
 0x719   : > { %3056 = vst [vmem:[%s5719_s26 + $0xe8] sm:$0xff] %v3014_v5  ;;  %v3009_v11 = vadd.f32 %v5716_v43, %v3008_v22 }
 0x71a   : > { %v4421_v57 = vpop.f32.mrf.mxu1 }
 0x71b   : > { %3055 = vst [vmem:[%s5719_s26 + $0xe0] sm:$0xff] %v3009_v11  ;;  %v3024_v51 = vadd.f32 %v4421_v57, %v5716_v43 }
 0x71c   : > { %v3018_v7 = vpop.f32.mrf.mxu1 }
 0x71d   : > { %3058 = vst [vmem:[%s5719_s26 + $0xf8] sm:$0xff] %v3024_v51  ;;  %v3019_v16 = vadd.f32 %v5716_v43, %v3018_v7 }
 0x71f   : > { %3057 = vst [vmem:[%s5719_s26 + $0xf0] sm:$0xff] %v3019_v16 }
 0x720   : > { %4563 = shalt.err (!%p4560_p1)
}
 0x721   : > { %s4564_s9 = scalar_lea.hbm %s5786_s4, 4096  ;;  %s4568_s17 = scalar_lea.hbm %s5838_s3, 8192 }
 0x722   : > { %p4565_p2 = scmp.ne.s32.totalorder %s5786_s4, %s4564_s9  ;;  %p4569_p7 = scmp.lt.s32.totalorder %s5786_s4, %s5838_s3 }
 0x723   : > { %p4570_p8 = scmp.lt.s32.totalorder %s4568_s17, %s4564_s9 }
 0x724   : > { %p4566_p3 = pnand %p4565_p2, %p4680_p5 }
 0x725   : > { %p4571_p6 = por %p4570_p8, %p4569_p7 }
 0x726   : > { %p4567_p4 = pneg %p4566_p3 }
 0x728   : > { %p4572_p9 = pnand %p4571_p6, %p4567_p4 }
 0x72a   : > { %4575 = shalt.err (!%p4572_p9)
}
 0x72b   : > { %s4620_s24 = smov 128   ;;  %s4621_s25 = smov 8  }
 0x72c   : > { %4458 = dma.vmem_to_hbm [thread:$0]  (%p4680_p5), %s5788_s28, 4096, %s5786_s4, %s5795_s16, %s4620_s24, %s4620_s24, %s4621_s25  }
 0x72d PF: > { %p4470_p10 = scmp.ge.s32.totalorder %s4614_s15, 2  ;;  %s3088_s26 = sand.u32 1, %s4602_s12  }
 0x72e   : > { %p5943_p11 = scmp.ne.s32.totalorder %s5882_s23, 0  ;;  %s3089_s27 = scalar_lea.sflag [#allocation4], %s3088_s26 }
 0x730   : > { %p4465_p12 = pnand %p4470_p10, %p5943_p11 }
 0x732   : > { %p4466_p13 = pneg %p4465_p12 }
 0x734   : > { %4597 = dma.done.wait (%p4466_p13), %s3089_s27, 4096  }
 0x735   : > { %4599 = vsyncadd (%p4466_p13), %s3089_s27, 4294963200  ;;  %p14_p0 = scmp.ge.s32.totalorder %s4667_s18, 4   ;;  %s5944_s12 = smov %s4606_s13 }
 0x736   : > { %s5945_s13 = smov %s4610_s14  ;;  %s5946_s14 = smov %s4678_s21 }
 0x737   : > { %s5947_s15 = smov %s4667_s18  ;;  %16 = sbr.rel (!%p14_p0) target bundleno = 4 (0x4), region = 76 }
 0x73c   :  { %3094 = vsyncpa [#allocation3], 1 }
 0x73d   :  { %3096 = vsyncpa [#allocation3 + $0x1], 1 }
 0x73e   :  { %3097 = vsyncpa [#allocation4], 1 }
 0x73f   :  { %3099 = vsyncpa [#allocation4 + $0x1], 1 }

</bundles_post_ra>
